<compile_context>
chip_gen: v6e
topology: v6e:2x2x1
jax: 0.10.0
libtpu: 0.0.40
codegen_flags: <defaults>
</compile_context>

<pallas_src>
import jax
import jax.numpy as jnp
from jax import lax
from jax.experimental import pallas as pl
from jax.experimental.pallas import tpu as pltpu

# ----------------------------- configuration ------------------------------ #
B        = 8          # batch size
T_SEQ    = 12          # "BERT" token sequence length (text is (B, 3, T_SEQ))
T_A      = 10          # audio sequence length
T_V      = 10          # vision sequence length
D_TOUT   = 32          # config.feature_dims[0]  (== d_tout)
D_AFEAT  = 16          # config.feature_dims[1]
D_VFEAT  = 24          # config.feature_dims[2]
D_AH     = 16          # audio LSTM hidden
D_VH     = 16          # vision LSTM hidden
D_AOUT   = 16          # d_aout
D_VOUT   = 16          # d_vout
D_PRJH   = 32          # d_prjh
N_CLASS  = 1           # regression head
LANES    = 128         # lane-dense output slab width

# lane packing assumes equal 16-wide audio / vision slots
assert D_AH == D_VH == D_AOUT == D_VOUT == 16
H = D_AH               # shared slot width for packed audio+vision lanes

# slab column offsets (must match concatenation order in the kernel)
OFF_T     = 0
OFF_A     = OFF_T + D_TOUT                  # 32
OFF_V     = OFF_A + D_AOUT                  # 48
OFF_F     = OFF_V + D_VOUT                  # 64
OFF_P     = OFF_F + D_PRJH                  # 96
OFF_LLD   = OFF_P + N_CLASS                 # 97  (lld_tv + lld_ta, per sample)
OFF_CPC_T = OFF_LLD + 1                     # 98
OFF_CPC_V = OFF_CPC_T + 1                   # 99
OFF_CPC_A = OFF_CPC_V + 1                   # 100
SLAB_USED = OFF_CPC_A + 1                   # 101
assert SLAB_USED <= LANES

VMEM_SPEC = pl.BlockSpec(memory_space=pltpu.MemorySpace.VMEM)


# ------------------------------ fused kernel ------------------------------- #
def mmim_fused_kernel(
        text_ref, alen_ref, vlen_ref, audio_ref, vision_ref,
        bert_w_ref, bert_b_ref,
        a_wih_ref, v_wih_ref, whh_ref, lstm_b_ref, wo_ref, bo_ref,
        mi_w1_ref, mi_b1_ref, mi_w2_ref, mi_b2_ref,
        cpc_w_ref, cpc_b_ref,
        f_w1_ref, f_b1_ref, f_w2_ref, f_b2_ref, f_w3_ref, f_b3_ref,
        o_ref):
    f32 = jnp.float32

    def mm(a, b):
        return jnp.dot(a, b, preferred_element_type=f32)

    bs = text_ref.shape[0]

    # --- text encoder (BERT [CLS] pooling stand-in) -------------------------
    # TODO(synk): real model uses a pretrained BERT; linear+tanh stand-in here.
    text_h = jnp.tanh(mm(text_ref[...], bert_w_ref[...]) + bert_b_ref[...])

    # --- lane-packed audio+vision LSTM (hoisted input projections) ----------
    Tmax = audio_ref.shape[0] // bs
    # gate layout (8H = 128 lanes): [i_a i_v | f_a f_v | g_a g_v | o_a o_v]
    gx = (mm(audio_ref[...], a_wih_ref[...])
          + mm(vision_ref[...], v_wih_ref[...])
          + lstm_b_ref[...])                                  # (Tmax*bs, 8H)
    whh = whh_ref[...]                                        # (2H, 8H)

    # per-sample valid-length mask lanes: [audio H | vision H]
    len_comb = jnp.concatenate(
        [jnp.broadcast_to(alen_ref[...], (bs, H)),
         jnp.broadcast_to(vlen_ref[...], (bs, H))], axis=1)   # (bs, 2H) int32

    h = jnp.zeros((bs, 2 * H), f32)                           # [h_a | h_v]
    c = jnp.zeros((bs, 2 * H), f32)

    # fully unrolled recurrence; ONE matmul + ONE sigmoid + ONE tanh per step
    for t in range(Tmax):
        g = gx[t * bs:(t + 1) * bs, :] + mm(h, whh)           # (bs, 8H)
        sig = jax.nn.sigmoid(g)
        tnh = jnp.tanh(g)
        i_g = sig[:, 0 * 2 * H:1 * 2 * H]
        f_g = sig[:, 1 * 2 * H:2 * 2 * H]
        g_g = tnh[:, 2 * 2 * H:3 * 2 * H]
        o_g = sig[:, 3 * 2 * H:4 * 2 * H]
        c_new = f_g * c + i_g * g_g
        h_new = o_g * jnp.tanh(c_new)
        m = len_comb > t                  # freeze state past valid length
        h = jnp.where(m, h_new, h)
        c = jnp.where(m, c_new, c)

    # dropout = identity (eval); RNNEncoder.linear_1, block-diag packed
    av_h = mm(h, wo_ref[...]) + bo_ref[...]                   # (bs, 2H) = [a|v]
    audio_h = av_h[:, 0:H]
    vision_h = av_h[:, H:2 * H]

    # --- packed MMILB lld (gaussian prior, y=None path) ----------------------
    # slot order: [mu_ta, mu_tv, logvar_ta, logvar_tv] (each H wide)
    h1 = jnp.maximum(mm(text_h, mi_w1_ref[...]) + mi_b1_ref[...], 0.0)   # (bs, 4H)
    out2 = mm(h1, mi_w2_ref[...]) + mi_b2_ref[...]                       # (bs, 4H)
    mu_all = out2[:, 0:2 * H]                 # [mu_ta | mu_tv] aligns with av_h
    lv_all = out2[:, 2 * H:4 * H]             # [lv_ta | lv_tv]
    positive = -((mu_all - av_h) ** 2) * 0.5 * jnp.exp(-lv_all)   # no VPU divide
    lld_ps = jnp.sum(positive, axis=-1, keepdims=True)            # sum_ta + sum_tv

    # --- fusion MLP (concat-free: W1 row-split by source modality) ----------
    pre1 = (mm(text_h, f_w1_ref[0:D_TOUT, :])
            + mm(av_h, f_w1_ref[D_TOUT:D_TOUT + 2 * H, :])
            + f_b1_ref[...])
    y1 = jnp.tanh(pre1)
    fusion = jnp.tanh(mm(y1, f_w2_ref[...]) + f_b2_ref[...])      # (bs, d_prjh)
    # n_class == 1: final linear as a lane reduction (avoids N=1 matmul)
    preds = jnp.sum(fusion * f_w3_ref[...], axis=-1, keepdims=True) + f_b3_ref[...]

    # --- CPC per-sample scores (pos - neg); -mean() done in wrapper ----------
    x_pred_all = mm(fusion, cpc_w_ref[...]) + cpc_b_ref[...]      # (bs, 64) [t|v|a]

    def cpc_ps(x, x_pred):
        xp = x_pred * lax.rsqrt(
            jnp.sum(x_pred * x_pred, axis=-1, keepdims=True) + 1e-24)
        xn = x * lax.rsqrt(jnp.sum(x * x, axis=-1, keepdims=True) + 1e-24)
        pos = jnp.sum(xn * xp, axis=-1, keepdims=True)            # (bs, 1)
        scores = lax.dot_general(xn, xp, (((1,), (1,)), ((), ())),
                                 preferred_element_type=f32)       # (bs, bs)
        mmax = jnp.max(scores, axis=-1, keepdims=True)
        neg = jnp.log(jnp.sum(jnp.exp(scores - mmax), axis=-1, keepdims=True)) + mmax
        return pos - neg

    cpc_t_ps = cpc_ps(text_h, x_pred_all[:, 0:D_TOUT])
    cpc_v_ps = cpc_ps(vision_h, x_pred_all[:, D_TOUT:D_TOUT + D_VOUT])
    cpc_a_ps = cpc_ps(audio_h,
                      x_pred_all[:, D_TOUT + D_VOUT:D_TOUT + D_VOUT + D_AOUT])

    # --- single lane-dense (bs, 128) output slab -----------------------------
    pieces = [text_h, av_h, fusion, preds, lld_ps, cpc_t_ps, cpc_v_ps, cpc_a_ps]
    used = sum(p_.shape[1] for p_ in pieces)
    pad_w = o_ref.shape[1] - used
    if pad_w > 0:
        pieces.append(jnp.zeros((bs, pad_w), f32))
    o_ref[...] = jnp.concatenate(pieces, axis=1)


# ------------------------------ parameter init ----------------------------- #
def linear_params(key, fan_in, fan_out):
    kw, kb = jax.random.split(key)
    bound = 1.0 / (fan_in ** 0.5)
    w = jax.random.uniform(kw, (fan_in, fan_out), jnp.float32, -bound, bound)
    b = jax.random.uniform(kb, (1, fan_out), jnp.float32, -bound, bound)
    return w, b


def lstm_params(key, in_size, hidden):
    k1, k2, k3 = jax.random.split(key, 3)
    bound = 1.0 / (hidden ** 0.5)
    wih = jax.random.uniform(k1, (in_size, 4 * hidden), jnp.float32, -bound, bound)
    whh = jax.random.uniform(k2, (hidden, 4 * hidden), jnp.float32, -bound, bound)
    b = jax.random.uniform(k3, (1, 4 * hidden), jnp.float32, -bound, bound)  # b_ih+b_hh folded
    return wih, whh, b


def _scatter_gates(mat, slot, h):
    """Place (rows, 4h) gate-major [i,f,g,o] weights into (rows, 8h) combined
    layout [i_a i_v | f_a f_v | g_a g_v | o_a o_v]; slot 0 = audio, 1 = vision."""
    rows = mat.shape[0]
    out = jnp.zeros((rows, 8 * h), mat.dtype)
    for g in range(4):
        out = out.at[:, (2 * g + slot) * h:(2 * g + slot + 1) * h].set(
            mat[:, g * h:(g + 1) * h])
    return out


def _block_diag(*mats):
    rows = sum(m.shape[0] for m in mats)
    cols = sum(m.shape[1] for m in mats)
    out = jnp.zeros((rows, cols), mats[0].dtype)
    r = c = 0
    for m in mats:
        out = out.at[r:r + m.shape[0], c:c + m.shape[1]].set(m)
        r += m.shape[0]
        c += m.shape[1]
    return out


def init_params(key):
    keys = jax.random.split(key, 16)
    p = {}
    p['bert_w'], p['bert_b'] = linear_params(keys[0], T_SEQ, D_TOUT)

    # --- RNN encoders: pack audio+vision into one lane-combined LSTM ---------
    a_wih, a_whh, a_b = lstm_params(keys[1], D_AFEAT, D_AH)
    a_wo, a_bo = linear_params(keys[2], D_AH, D_AOUT)
    v_wih, v_whh, v_b = lstm_params(keys[3], D_VFEAT, D_VH)
    v_wo, v_bo = linear_params(keys[4], D_VH, D_VOUT)

    p['a_wih_c'] = _scatter_gates(a_wih, 0, H)                     # (D_AFEAT, 8H)
    p['v_wih_c'] = _scatter_gates(v_wih, 1, H)                     # (D_VFEAT, 8H)
    p['whh_c'] = jnp.concatenate([_scatter_gates(a_whh, 0, H),
                                  _scatter_gates(v_whh, 1, H)], axis=0)  # (2H, 8H)
    p['lstm_b_c'] = _scatter_gates(a_b, 0, H) + _scatter_gates(v_b, 1, H)
    p['wo_c'] = _block_diag(a_wo, v_wo)                            # (2H, 2H)
    p['bo_c'] = jnp.concatenate([a_bo, v_bo], axis=1)              # (1, 2H)

    # --- MMILB (mu / logvar MLPs) packed for both pairs ----------------------
    def mmilb_p(k, x_size, y_size):
        k1, k2, k3, k4 = jax.random.split(k, 4)
        mw1, mb1 = linear_params(k1, x_size, y_size)
        mw2, mb2 = linear_params(k2, y_size, y_size)
        lw1, lb1 = linear_params(k3, x_size, y_size)
        lw2, lb2 = linear_params(k4, y_size, y_size)
        return mw1, mb1, mw2, mb2, lw1, lb1, lw2, lb2

    ta = mmilb_p(keys[5], D_TOUT, D_AOUT)
    tv = mmilb_p(keys[6], D_TOUT, D_VOUT)
    # slot order: [mu_ta, mu_tv, logvar_ta, logvar_tv]
    p['mi_w1_c'] = jnp.concatenate([ta[0], tv[0], ta[4], tv[4]], axis=1)  # (D_TOUT, 4H)
    p['mi_b1_c'] = jnp.concatenate([ta[1], tv[1], ta[5], tv[5]], axis=1)
    p['mi_w2_c'] = _block_diag(ta[2], tv[2], ta[6], tv[6])                # (4H, 4H)
    p['mi_b2_c'] = jnp.concatenate([ta[3], tv[3], ta[7], tv[7]], axis=1)

    # --- CPC projections packed ----------------------------------------------
    ct_w, ct_b = linear_params(keys[7], D_PRJH, D_TOUT)
    cv_w, cv_b = linear_params(keys[8], D_PRJH, D_VOUT)
    ca_w, ca_b = linear_params(keys[9], D_PRJH, D_AOUT)
    p['cpc_w_c'] = jnp.concatenate([ct_w, cv_w, ca_w], axis=1)            # (D_PRJH, 64)
    p['cpc_b_c'] = jnp.concatenate([ct_b, cv_b, ca_b], axis=1)

    # --- fusion head ----------------------------------------------------------
    dim_sum = D_TOUT + D_AOUT + D_VOUT
    p['fus_w1'], p['fus_b1'] = linear_params(keys[10], dim_sum, D_PRJH)
    p['fus_w2'], p['fus_b2'] = linear_params(keys[11], D_PRJH, D_PRJH)
    w3, b3 = linear_params(keys[12], D_PRJH, N_CLASS)
    p['fus_w3'] = w3.T                      # (1, D_PRJH) row for lane reduction
    p['fus_b3'] = b3                        # (1, 1)
    return p


# ------------------------------- MMIM forward ------------------------------ #
def mmim_forward(p, text, audio, audio_lengths, vision, vision_lengths):
    bs = text.shape[0]
    Ta, Tv = audio.shape[1], vision.shape[1]
    Tmax = max(Ta, Tv)
    # zero-pad to a shared time extent; length masking freezes states anyway
    if Ta < Tmax:
        audio = jnp.pad(audio, ((0, 0), (0, Tmax - Ta), (0, 0)))
    if Tv < Tmax:
        vision = jnp.pad(vision, ((0, 0), (0, Tmax - Tv), (0, 0)))

    # input plumbing (one tiny XLA op per modality): [CLS]-row pick and
    # time-major flatten so the in-kernel hoisted projection is one matmul.
    text_feat = text[:, 0, :].astype(jnp.float32)                       # (B, T_SEQ)
    audio_tm = jnp.transpose(audio, (1, 0, 2)).reshape(
        Tmax * bs, audio.shape[2]).astype(jnp.float32)
    vision_tm = jnp.transpose(vision, (1, 0, 2)).reshape(
        Tmax * bs, vision.shape[2]).astype(jnp.float32)
    alen = audio_lengths.reshape(bs, 1).astype(jnp.int32)
    vlen = vision_lengths.reshape(bs, 1).astype(jnp.int32)

    inputs = [
        text_feat, alen, vlen, audio_tm, vision_tm,
        p['bert_w'], p['bert_b'],
        p['a_wih_c'], p['v_wih_c'], p['whh_c'], p['lstm_b_c'], p['wo_c'], p['bo_c'],
        p['mi_w1_c'], p['mi_b1_c'], p['mi_w2_c'], p['mi_b2_c'],
        p['cpc_w_c'], p['cpc_b_c'],
        p['fus_w1'], p['fus_b1'], p['fus_w2'], p['fus_b2'], p['fus_w3'], p['fus_b3'],
    ]

    slab = pl.pallas_call(
        mmim_fused_kernel,
        out_shape=jax.ShapeDtypeStruct((bs, LANES), jnp.float32),
        in_specs=[VMEM_SPEC] * len(inputs),
        out_specs=VMEM_SPEC,
    )(*inputs)

    text_h = slab[:, OFF_T:OFF_T + D_TOUT]
    audio_h = slab[:, OFF_A:OFF_A + D_AOUT]
    vision_h = slab[:, OFF_V:OFF_V + D_VOUT]
    fusion = slab[:, OFF_F:OFF_F + D_PRJH]
    preds = slab[:, OFF_P:OFF_P + N_CLASS]

    lld = jnp.mean(slab[:, OFF_LLD])                     # = lld_tv + lld_ta
    nce = -(jnp.mean(slab[:, OFF_CPC_T])
            + jnp.mean(slab[:, OFF_CPC_V])
            + jnp.mean(slab[:, OFF_CPC_A]))
    H_ent = 0.0                                          # y=None path: no entropy term

    return {
        'Feature_t': text_h,
        'Feature_a': audio_h,
        'Feature_v': vision_h,
        'Feature_f': fusion,
        'lld': lld,
        'nce': nce,
        'pn_dic': {'tv': {'pos': None, 'neg': None},
                   'ta': {'pos': None, 'neg': None},
                   'va': None},
        'H': H_ent,
        'M': preds,
    }


# ----------------------------------- main ----------------------------------- #
if __name__ == "__main__":
    key = jax.random.PRNGKey(0)
    kp, kt, ka, kv = jax.random.split(key, 4)

    params = init_params(kp)

    # text: (B, 3, T_SEQ) BERT-style packed input (ids / mask / segment rows)
    text = jax.random.uniform(kt, (B, 3, T_SEQ), jnp.float32, 0.0, 1.0)
    audio = jax.random.normal(ka, (B, T_A, D_AFEAT), jnp.float32)
    vision = jax.random.normal(kv, (B, T_V, D_VFEAT), jnp.float32)
    audio_lengths = jnp.array([10, 7, 9, 5, 10, 3, 8, 6], dtype=jnp.int32)
    vision_lengths = jnp.array([10, 9, 4, 10, 6, 7, 10, 5], dtype=jnp.int32)

    fwd = jax.jit(mmim_forward)
    res = fwd(params, text, audio, audio_lengths, vision, vision_lengths)

    jax.block_until_ready((res['Feature_t'], res['Feature_a'], res['Feature_v'],
                           res['Feature_f'], res['M'], res['lld'], res['nce']))
    print("KERNEL_OK")
</pallas_src>

<mosaic_0001>
module attributes {stable_mosaic.version = 11 : i64} {
  func.func @mmim_fused_kernel(%arg0: memref<8x12xf32, #tpu.memory_space<vmem>>, %arg1: memref<8x1xi32, #tpu.memory_space<vmem>>, %arg2: memref<8x1xi32, #tpu.memory_space<vmem>>, %arg3: memref<80x16xf32, #tpu.memory_space<vmem>>, %arg4: memref<80x24xf32, #tpu.memory_space<vmem>>, %arg5: memref<12x32xf32, #tpu.memory_space<vmem>>, %arg6: memref<1x32xf32, #tpu.memory_space<vmem>>, %arg7: memref<16x128xf32, #tpu.memory_space<vmem>>, %arg8: memref<24x128xf32, #tpu.memory_space<vmem>>, %arg9: memref<32x128xf32, #tpu.memory_space<vmem>>, %arg10: memref<1x128xf32, #tpu.memory_space<vmem>>, %arg11: memref<32x32xf32, #tpu.memory_space<vmem>>, %arg12: memref<1x32xf32, #tpu.memory_space<vmem>>, %arg13: memref<32x64xf32, #tpu.memory_space<vmem>>, %arg14: memref<1x64xf32, #tpu.memory_space<vmem>>, %arg15: memref<64x64xf32, #tpu.memory_space<vmem>>, %arg16: memref<1x64xf32, #tpu.memory_space<vmem>>, %arg17: memref<32x64xf32, #tpu.memory_space<vmem>>, %arg18: memref<1x64xf32, #tpu.memory_space<vmem>>, %arg19: memref<64x32xf32, #tpu.memory_space<vmem>>, %arg20: memref<1x32xf32, #tpu.memory_space<vmem>>, %arg21: memref<32x32xf32, #tpu.memory_space<vmem>>, %arg22: memref<1x32xf32, #tpu.memory_space<vmem>>, %arg23: memref<1x32xf32, #tpu.memory_space<vmem>>, %arg24: memref<1x1xf32, #tpu.memory_space<vmem>>, %arg25: memref<8x128xf32, #tpu.memory_space<vmem>>) attributes {dimension_semantics = [], scalar_prefetch = 0 : i64, scratch_operands = 0 : i64, tpu.core_type = #tpu.core_type<tc>} {
    %c0 = arith.constant 0 : index
    %c0_0 = arith.constant 0 : index
    %0 = vector.load %arg0[%c0, %c0_0] : memref<8x12xf32, #tpu.memory_space<vmem>>, vector<8x12xf32>
    %c0_1 = arith.constant 0 : index
    %c0_2 = arith.constant 0 : index
    %1 = vector.load %arg5[%c0_1, %c0_2] : memref<12x32xf32, #tpu.memory_space<vmem>>, vector<12x32xf32>
    %cst = arith.constant dense<0.000000e+00> : vector<8x32xf32>
    %2 = tpu.matmul %0, %1, %cst {dimension_numbers = #tpu.dot_dimension_numbers<[1], [0], [0], [1], [0, 0, 1, 1], [], []>} : vector<8x12xf32>, vector<12x32xf32>, vector<8x32xf32> -> vector<8x32xf32>
    %c0_3 = arith.constant 0 : index
    %c0_4 = arith.constant 0 : index
    %3 = vector.load %arg6[%c0_3, %c0_4] : memref<1x32xf32, #tpu.memory_space<vmem>>, vector<1x32xf32>
    %4 = vector.broadcast %3 : vector<1x32xf32> to vector<8x32xf32>
    %5 = arith.addf %2, %4 : vector<8x32xf32>
    %6 = math.tanh %5 : vector<8x32xf32>
    %c0_5 = arith.constant 0 : index
    %c0_6 = arith.constant 0 : index
    %7 = vector.load %arg3[%c0_5, %c0_6] : memref<80x16xf32, #tpu.memory_space<vmem>>, vector<80x16xf32>
    %c0_7 = arith.constant 0 : index
    %c0_8 = arith.constant 0 : index
    %8 = vector.load %arg7[%c0_7, %c0_8] : memref<16x128xf32, #tpu.memory_space<vmem>>, vector<16x128xf32>
    %cst_9 = arith.constant dense<0.000000e+00> : vector<80x128xf32>
    %9 = tpu.matmul %7, %8, %cst_9 {dimension_numbers = #tpu.dot_dimension_numbers<[1], [0], [0], [1], [0, 0, 1, 1], [], []>} : vector<80x16xf32>, vector<16x128xf32>, vector<80x128xf32> -> vector<80x128xf32>
    %c0_10 = arith.constant 0 : index
    %c0_11 = arith.constant 0 : index
    %10 = vector.load %arg4[%c0_10, %c0_11] : memref<80x24xf32, #tpu.memory_space<vmem>>, vector<80x24xf32>
    %c0_12 = arith.constant 0 : index
    %c0_13 = arith.constant 0 : index
    %11 = vector.load %arg8[%c0_12, %c0_13] : memref<24x128xf32, #tpu.memory_space<vmem>>, vector<24x128xf32>
    %cst_14 = arith.constant dense<0.000000e+00> : vector<80x128xf32>
    %12 = tpu.matmul %10, %11, %cst_14 {dimension_numbers = #tpu.dot_dimension_numbers<[1], [0], [0], [1], [0, 0, 1, 1], [], []>} : vector<80x24xf32>, vector<24x128xf32>, vector<80x128xf32> -> vector<80x128xf32>
    %13 = arith.addf %9, %12 : vector<80x128xf32>
    %c0_15 = arith.constant 0 : index
    %c0_16 = arith.constant 0 : index
    %14 = vector.load %arg10[%c0_15, %c0_16] : memref<1x128xf32, #tpu.memory_space<vmem>>, vector<1x128xf32>
    %15 = vector.broadcast %14 : vector<1x128xf32> to vector<80x128xf32>
    %16 = arith.addf %13, %15 : vector<80x128xf32>
    %c0_17 = arith.constant 0 : index
    %c0_18 = arith.constant 0 : index
    %17 = vector.load %arg9[%c0_17, %c0_18] : memref<32x128xf32, #tpu.memory_space<vmem>>, vector<32x128xf32>
    %c0_19 = arith.constant 0 : index
    %c0_20 = arith.constant 0 : index
    %18 = vector.load %arg1[%c0_19, %c0_20] : memref<8x1xi32, #tpu.memory_space<vmem>>, vector<8x1xi32>
    %19 = vector.shape_cast %18 : vector<8x1xi32> to vector<8x1xi32>
    %20 = vector.broadcast %19 : vector<8x1xi32> to vector<8x16xi32>
    %c0_21 = arith.constant 0 : index
    %c0_22 = arith.constant 0 : index
    %21 = vector.load %arg2[%c0_21, %c0_22] : memref<8x1xi32, #tpu.memory_space<vmem>>, vector<8x1xi32>
    %22 = vector.shape_cast %21 : vector<8x1xi32> to vector<8x1xi32>
    %23 = vector.broadcast %22 : vector<8x1xi32> to vector<8x16xi32>
    %24 = tpu.concatenate %20, %23 in 1 : vector<8x16xi32>, vector<8x16xi32> -> vector<8x32xi32>
    %cst_23 = arith.constant 0.000000e+00 : f32
    %25 = vector.broadcast %cst_23 : f32 to vector<8x32xf32>
    %cst_24 = arith.constant 0.000000e+00 : f32
    %26 = vector.broadcast %cst_24 : f32 to vector<8x32xf32>
    %27 = vector.extract_strided_slice %16 {offsets = [0, 0], sizes = [8, 128], strides = [1, 1]} : vector<80x128xf32> to vector<8x128xf32>
    %cst_25 = arith.constant dense<0.000000e+00> : vector<8x128xf32>
    %28 = tpu.matmul %25, %17, %cst_25 {dimension_numbers = #tpu.dot_dimension_numbers<[1], [0], [0], [1], [0, 0, 1, 1], [], []>} : vector<8x32xf32>, vector<32x128xf32>, vector<8x128xf32> -> vector<8x128xf32>
    %29 = arith.addf %27, %28 : vector<8x128xf32>
    %30 = arith.negf %29 : vector<8x128xf32>
    %31 = math.exp %30 : vector<8x128xf32>
    %cst_26 = arith.constant 1.000000e+00 : f32
    %32 = vector.broadcast %cst_26 : f32 to vector<8x128xf32>
    %33 = arith.addf %32, %31 : vector<8x128xf32>
    %34 = arith.divf %32, %33 : vector<8x128xf32>
    %35 = math.tanh %29 : vector<8x128xf32>
    %36 = vector.extract_strided_slice %34 {offsets = [0, 0], sizes = [8, 32], strides = [1, 1]} : vector<8x128xf32> to vector<8x32xf32>
    %37 = vector.extract_strided_slice %34 {offsets = [0, 32], sizes = [8, 32], strides = [1, 1]} : vector<8x128xf32> to vector<8x32xf32>
    %38 = vector.extract_strided_slice %35 {offsets = [0, 64], sizes = [8, 32], strides = [1, 1]} : vector<8x128xf32> to vector<8x32xf32>
    %39 = vector.extract_strided_slice %34 {offsets = [0, 96], sizes = [8, 32], strides = [1, 1]} : vector<8x128xf32> to vector<8x32xf32>
    %40 = arith.mulf %37, %26 : vector<8x32xf32>
    %41 = arith.mulf %36, %38 : vector<8x32xf32>
    %42 = arith.addf %40, %41 : vector<8x32xf32>
    %43 = math.tanh %42 : vector<8x32xf32>
    %44 = arith.mulf %39, %43 : vector<8x32xf32>
    %c0_i32 = arith.constant 0 : i32
    %45 = vector.broadcast %c0_i32 : i32 to vector<8x32xi32>
    %46 = arith.cmpi sgt, %24, %45 : vector<8x32xi32>
    %47 = arith.select %46, %44, %25 : vector<8x32xi1>, vector<8x32xf32>
    %48 = arith.select %46, %42, %26 : vector<8x32xi1>, vector<8x32xf32>
    %49 = vector.extract_strided_slice %16 {offsets = [8, 0], sizes = [8, 128], strides = [1, 1]} : vector<80x128xf32> to vector<8x128xf32>
    %cst_27 = arith.constant dense<0.000000e+00> : vector<8x128xf32>
    %50 = tpu.matmul %47, %17, %cst_27 {dimension_numbers = #tpu.dot_dimension_numbers<[1], [0], [0], [1], [0, 0, 1, 1], [], []>} : vector<8x32xf32>, vector<32x128xf32>, vector<8x128xf32> -> vector<8x128xf32>
    %51 = arith.addf %49, %50 : vector<8x128xf32>
    %52 = arith.negf %51 : vector<8x128xf32>
    %53 = math.exp %52 : vector<8x128xf32>
    %cst_28 = arith.constant 1.000000e+00 : f32
    %54 = vector.broadcast %cst_28 : f32 to vector<8x128xf32>
    %55 = arith.addf %54, %53 : vector<8x128xf32>
    %56 = arith.divf %54, %55 : vector<8x128xf32>
    %57 = math.tanh %51 : vector<8x128xf32>
    %58 = vector.extract_strided_slice %56 {offsets = [0, 0], sizes = [8, 32], strides = [1, 1]} : vector<8x128xf32> to vector<8x32xf32>
    %59 = vector.extract_strided_slice %56 {offsets = [0, 32], sizes = [8, 32], strides = [1, 1]} : vector<8x128xf32> to vector<8x32xf32>
    %60 = vector.extract_strided_slice %57 {offsets = [0, 64], sizes = [8, 32], strides = [1, 1]} : vector<8x128xf32> to vector<8x32xf32>
    %61 = vector.extract_strided_slice %56 {offsets = [0, 96], sizes = [8, 32], strides = [1, 1]} : vector<8x128xf32> to vector<8x32xf32>
    %62 = arith.mulf %59, %48 : vector<8x32xf32>
    %63 = arith.mulf %58, %60 : vector<8x32xf32>
    %64 = arith.addf %62, %63 : vector<8x32xf32>
    %65 = math.tanh %64 : vector<8x32xf32>
    %66 = arith.mulf %61, %65 : vector<8x32xf32>
    %c1_i32 = arith.constant 1 : i32
    %67 = vector.broadcast %c1_i32 : i32 to vector<8x32xi32>
    %68 = arith.cmpi sgt, %24, %67 : vector<8x32xi32>
    %69 = arith.select %68, %66, %47 : vector<8x32xi1>, vector<8x32xf32>
    %70 = arith.select %68, %64, %48 : vector<8x32xi1>, vector<8x32xf32>
    %71 = vector.extract_strided_slice %16 {offsets = [16, 0], sizes = [8, 128], strides = [1, 1]} : vector<80x128xf32> to vector<8x128xf32>
    %cst_29 = arith.constant dense<0.000000e+00> : vector<8x128xf32>
    %72 = tpu.matmul %69, %17, %cst_29 {dimension_numbers = #tpu.dot_dimension_numbers<[1], [0], [0], [1], [0, 0, 1, 1], [], []>} : vector<8x32xf32>, vector<32x128xf32>, vector<8x128xf32> -> vector<8x128xf32>
    %73 = arith.addf %71, %72 : vector<8x128xf32>
    %74 = arith.negf %73 : vector<8x128xf32>
    %75 = math.exp %74 : vector<8x128xf32>
    %cst_30 = arith.constant 1.000000e+00 : f32
    %76 = vector.broadcast %cst_30 : f32 to vector<8x128xf32>
    %77 = arith.addf %76, %75 : vector<8x128xf32>
    %78 = arith.divf %76, %77 : vector<8x128xf32>
    %79 = math.tanh %73 : vector<8x128xf32>
    %80 = vector.extract_strided_slice %78 {offsets = [0, 0], sizes = [8, 32], strides = [1, 1]} : vector<8x128xf32> to vector<8x32xf32>
    %81 = vector.extract_strided_slice %78 {offsets = [0, 32], sizes = [8, 32], strides = [1, 1]} : vector<8x128xf32> to vector<8x32xf32>
    %82 = vector.extract_strided_slice %79 {offsets = [0, 64], sizes = [8, 32], strides = [1, 1]} : vector<8x128xf32> to vector<8x32xf32>
    %83 = vector.extract_strided_slice %78 {offsets = [0, 96], sizes = [8, 32], strides = [1, 1]} : vector<8x128xf32> to vector<8x32xf32>
    %84 = arith.mulf %81, %70 : vector<8x32xf32>
    %85 = arith.mulf %80, %82 : vector<8x32xf32>
    %86 = arith.addf %84, %85 : vector<8x32xf32>
    %87 = math.tanh %86 : vector<8x32xf32>
    %88 = arith.mulf %83, %87 : vector<8x32xf32>
    %c2_i32 = arith.constant 2 : i32
    %89 = vector.broadcast %c2_i32 : i32 to vector<8x32xi32>
    %90 = arith.cmpi sgt, %24, %89 : vector<8x32xi32>
    %91 = arith.select %90, %88, %69 : vector<8x32xi1>, vector<8x32xf32>
    %92 = arith.select %90, %86, %70 : vector<8x32xi1>, vector<8x32xf32>
    %93 = vector.extract_strided_slice %16 {offsets = [24, 0], sizes = [8, 128], strides = [1, 1]} : vector<80x128xf32> to vector<8x128xf32>
    %cst_31 = arith.constant dense<0.000000e+00> : vector<8x128xf32>
    %94 = tpu.matmul %91, %17, %cst_31 {dimension_numbers = #tpu.dot_dimension_numbers<[1], [0], [0], [1], [0, 0, 1, 1], [], []>} : vector<8x32xf32>, vector<32x128xf32>, vector<8x128xf32> -> vector<8x128xf32>
    %95 = arith.addf %93, %94 : vector<8x128xf32>
    %96 = arith.negf %95 : vector<8x128xf32>
    %97 = math.exp %96 : vector<8x128xf32>
    %cst_32 = arith.constant 1.000000e+00 : f32
    %98 = vector.broadcast %cst_32 : f32 to vector<8x128xf32>
    %99 = arith.addf %98, %97 : vector<8x128xf32>
    %100 = arith.divf %98, %99 : vector<8x128xf32>
    %101 = math.tanh %95 : vector<8x128xf32>
    %102 = vector.extract_strided_slice %100 {offsets = [0, 0], sizes = [8, 32], strides = [1, 1]} : vector<8x128xf32> to vector<8x32xf32>
    %103 = vector.extract_strided_slice %100 {offsets = [0, 32], sizes = [8, 32], strides = [1, 1]} : vector<8x128xf32> to vector<8x32xf32>
    %104 = vector.extract_strided_slice %101 {offsets = [0, 64], sizes = [8, 32], strides = [1, 1]} : vector<8x128xf32> to vector<8x32xf32>
    %105 = vector.extract_strided_slice %100 {offsets = [0, 96], sizes = [8, 32], strides = [1, 1]} : vector<8x128xf32> to vector<8x32xf32>
    %106 = arith.mulf %103, %92 : vector<8x32xf32>
    %107 = arith.mulf %102, %104 : vector<8x32xf32>
    %108 = arith.addf %106, %107 : vector<8x32xf32>
    %109 = math.tanh %108 : vector<8x32xf32>
    %110 = arith.mulf %105, %109 : vector<8x32xf32>
    %c3_i32 = arith.constant 3 : i32
    %111 = vector.broadcast %c3_i32 : i32 to vector<8x32xi32>
    %112 = arith.cmpi sgt, %24, %111 : vector<8x32xi32>
    %113 = arith.select %112, %110, %91 : vector<8x32xi1>, vector<8x32xf32>
    %114 = arith.select %112, %108, %92 : vector<8x32xi1>, vector<8x32xf32>
    %115 = vector.extract_strided_slice %16 {offsets = [32, 0], sizes = [8, 128], strides = [1, 1]} : vector<80x128xf32> to vector<8x128xf32>
    %cst_33 = arith.constant dense<0.000000e+00> : vector<8x128xf32>
    %116 = tpu.matmul %113, %17, %cst_33 {dimension_numbers = #tpu.dot_dimension_numbers<[1], [0], [0], [1], [0, 0, 1, 1], [], []>} : vector<8x32xf32>, vector<32x128xf32>, vector<8x128xf32> -> vector<8x128xf32>
    %117 = arith.addf %115, %116 : vector<8x128xf32>
    %118 = arith.negf %117 : vector<8x128xf32>
    %119 = math.exp %118 : vector<8x128xf32>
    %cst_34 = arith.constant 1.000000e+00 : f32
    %120 = vector.broadcast %cst_34 : f32 to vector<8x128xf32>
    %121 = arith.addf %120, %119 : vector<8x128xf32>
    %122 = arith.divf %120, %121 : vector<8x128xf32>
    %123 = math.tanh %117 : vector<8x128xf32>
    %124 = vector.extract_strided_slice %122 {offsets = [0, 0], sizes = [8, 32], strides = [1, 1]} : vector<8x128xf32> to vector<8x32xf32>
    %125 = vector.extract_strided_slice %122 {offsets = [0, 32], sizes = [8, 32], strides = [1, 1]} : vector<8x128xf32> to vector<8x32xf32>
    %126 = vector.extract_strided_slice %123 {offsets = [0, 64], sizes = [8, 32], strides = [1, 1]} : vector<8x128xf32> to vector<8x32xf32>
    %127 = vector.extract_strided_slice %122 {offsets = [0, 96], sizes = [8, 32], strides = [1, 1]} : vector<8x128xf32> to vector<8x32xf32>
    %128 = arith.mulf %125, %114 : vector<8x32xf32>
    %129 = arith.mulf %124, %126 : vector<8x32xf32>
    %130 = arith.addf %128, %129 : vector<8x32xf32>
    %131 = math.tanh %130 : vector<8x32xf32>
    %132 = arith.mulf %127, %131 : vector<8x32xf32>
    %c4_i32 = arith.constant 4 : i32
    %133 = vector.broadcast %c4_i32 : i32 to vector<8x32xi32>
    %134 = arith.cmpi sgt, %24, %133 : vector<8x32xi32>
    %135 = arith.select %134, %132, %113 : vector<8x32xi1>, vector<8x32xf32>
    %136 = arith.select %134, %130, %114 : vector<8x32xi1>, vector<8x32xf32>
    %137 = vector.extract_strided_slice %16 {offsets = [40, 0], sizes = [8, 128], strides = [1, 1]} : vector<80x128xf32> to vector<8x128xf32>
    %cst_35 = arith.constant dense<0.000000e+00> : vector<8x128xf32>
    %138 = tpu.matmul %135, %17, %cst_35 {dimension_numbers = #tpu.dot_dimension_numbers<[1], [0], [0], [1], [0, 0, 1, 1], [], []>} : vector<8x32xf32>, vector<32x128xf32>, vector<8x128xf32> -> vector<8x128xf32>
    %139 = arith.addf %137, %138 : vector<8x128xf32>
    %140 = arith.negf %139 : vector<8x128xf32>
    %141 = math.exp %140 : vector<8x128xf32>
    %cst_36 = arith.constant 1.000000e+00 : f32
    %142 = vector.broadcast %cst_36 : f32 to vector<8x128xf32>
    %143 = arith.addf %142, %141 : vector<8x128xf32>
    %144 = arith.divf %142, %143 : vector<8x128xf32>
    %145 = math.tanh %139 : vector<8x128xf32>
    %146 = vector.extract_strided_slice %144 {offsets = [0, 0], sizes = [8, 32], strides = [1, 1]} : vector<8x128xf32> to vector<8x32xf32>
    %147 = vector.extract_strided_slice %144 {offsets = [0, 32], sizes = [8, 32], strides = [1, 1]} : vector<8x128xf32> to vector<8x32xf32>
    %148 = vector.extract_strided_slice %145 {offsets = [0, 64], sizes = [8, 32], strides = [1, 1]} : vector<8x128xf32> to vector<8x32xf32>
    %149 = vector.extract_strided_slice %144 {offsets = [0, 96], sizes = [8, 32], strides = [1, 1]} : vector<8x128xf32> to vector<8x32xf32>
    %150 = arith.mulf %147, %136 : vector<8x32xf32>
    %151 = arith.mulf %146, %148 : vector<8x32xf32>
    %152 = arith.addf %150, %151 : vector<8x32xf32>
    %153 = math.tanh %152 : vector<8x32xf32>
    %154 = arith.mulf %149, %153 : vector<8x32xf32>
    %c5_i32 = arith.constant 5 : i32
    %155 = vector.broadcast %c5_i32 : i32 to vector<8x32xi32>
    %156 = arith.cmpi sgt, %24, %155 : vector<8x32xi32>
    %157 = arith.select %156, %154, %135 : vector<8x32xi1>, vector<8x32xf32>
    %158 = arith.select %156, %152, %136 : vector<8x32xi1>, vector<8x32xf32>
    %159 = vector.extract_strided_slice %16 {offsets = [48, 0], sizes = [8, 128], strides = [1, 1]} : vector<80x128xf32> to vector<8x128xf32>
    %cst_37 = arith.constant dense<0.000000e+00> : vector<8x128xf32>
    %160 = tpu.matmul %157, %17, %cst_37 {dimension_numbers = #tpu.dot_dimension_numbers<[1], [0], [0], [1], [0, 0, 1, 1], [], []>} : vector<8x32xf32>, vector<32x128xf32>, vector<8x128xf32> -> vector<8x128xf32>
    %161 = arith.addf %159, %160 : vector<8x128xf32>
    %162 = arith.negf %161 : vector<8x128xf32>
    %163 = math.exp %162 : vector<8x128xf32>
    %cst_38 = arith.constant 1.000000e+00 : f32
    %164 = vector.broadcast %cst_38 : f32 to vector<8x128xf32>
    %165 = arith.addf %164, %163 : vector<8x128xf32>
    %166 = arith.divf %164, %165 : vector<8x128xf32>
    %167 = math.tanh %161 : vector<8x128xf32>
    %168 = vector.extract_strided_slice %166 {offsets = [0, 0], sizes = [8, 32], strides = [1, 1]} : vector<8x128xf32> to vector<8x32xf32>
    %169 = vector.extract_strided_slice %166 {offsets = [0, 32], sizes = [8, 32], strides = [1, 1]} : vector<8x128xf32> to vector<8x32xf32>
    %170 = vector.extract_strided_slice %167 {offsets = [0, 64], sizes = [8, 32], strides = [1, 1]} : vector<8x128xf32> to vector<8x32xf32>
    %171 = vector.extract_strided_slice %166 {offsets = [0, 96], sizes = [8, 32], strides = [1, 1]} : vector<8x128xf32> to vector<8x32xf32>
    %172 = arith.mulf %169, %158 : vector<8x32xf32>
    %173 = arith.mulf %168, %170 : vector<8x32xf32>
    %174 = arith.addf %172, %173 : vector<8x32xf32>
    %175 = math.tanh %174 : vector<8x32xf32>
    %176 = arith.mulf %171, %175 : vector<8x32xf32>
    %c6_i32 = arith.constant 6 : i32
    %177 = vector.broadcast %c6_i32 : i32 to vector<8x32xi32>
    %178 = arith.cmpi sgt, %24, %177 : vector<8x32xi32>
    %179 = arith.select %178, %176, %157 : vector<8x32xi1>, vector<8x32xf32>
    %180 = arith.select %178, %174, %158 : vector<8x32xi1>, vector<8x32xf32>
    %181 = vector.extract_strided_slice %16 {offsets = [56, 0], sizes = [8, 128], strides = [1, 1]} : vector<80x128xf32> to vector<8x128xf32>
    %cst_39 = arith.constant dense<0.000000e+00> : vector<8x128xf32>
    %182 = tpu.matmul %179, %17, %cst_39 {dimension_numbers = #tpu.dot_dimension_numbers<[1], [0], [0], [1], [0, 0, 1, 1], [], []>} : vector<8x32xf32>, vector<32x128xf32>, vector<8x128xf32> -> vector<8x128xf32>
    %183 = arith.addf %181, %182 : vector<8x128xf32>
    %184 = arith.negf %183 : vector<8x128xf32>
    %185 = math.exp %184 : vector<8x128xf32>
    %cst_40 = arith.constant 1.000000e+00 : f32
    %186 = vector.broadcast %cst_40 : f32 to vector<8x128xf32>
    %187 = arith.addf %186, %185 : vector<8x128xf32>
    %188 = arith.divf %186, %187 : vector<8x128xf32>
    %189 = math.tanh %183 : vector<8x128xf32>
    %190 = vector.extract_strided_slice %188 {offsets = [0, 0], sizes = [8, 32], strides = [1, 1]} : vector<8x128xf32> to vector<8x32xf32>
    %191 = vector.extract_strided_slice %188 {offsets = [0, 32], sizes = [8, 32], strides = [1, 1]} : vector<8x128xf32> to vector<8x32xf32>
    %192 = vector.extract_strided_slice %189 {offsets = [0, 64], sizes = [8, 32], strides = [1, 1]} : vector<8x128xf32> to vector<8x32xf32>
    %193 = vector.extract_strided_slice %188 {offsets = [0, 96], sizes = [8, 32], strides = [1, 1]} : vector<8x128xf32> to vector<8x32xf32>
    %194 = arith.mulf %191, %180 : vector<8x32xf32>
    %195 = arith.mulf %190, %192 : vector<8x32xf32>
    %196 = arith.addf %194, %195 : vector<8x32xf32>
    %197 = math.tanh %196 : vector<8x32xf32>
    %198 = arith.mulf %193, %197 : vector<8x32xf32>
    %c7_i32 = arith.constant 7 : i32
    %199 = vector.broadcast %c7_i32 : i32 to vector<8x32xi32>
    %200 = arith.cmpi sgt, %24, %199 : vector<8x32xi32>
    %201 = arith.select %200, %198, %179 : vector<8x32xi1>, vector<8x32xf32>
    %202 = arith.select %200, %196, %180 : vector<8x32xi1>, vector<8x32xf32>
    %203 = vector.extract_strided_slice %16 {offsets = [64, 0], sizes = [8, 128], strides = [1, 1]} : vector<80x128xf32> to vector<8x128xf32>
    %cst_41 = arith.constant dense<0.000000e+00> : vector<8x128xf32>
    %204 = tpu.matmul %201, %17, %cst_41 {dimension_numbers = #tpu.dot_dimension_numbers<[1], [0], [0], [1], [0, 0, 1, 1], [], []>} : vector<8x32xf32>, vector<32x128xf32>, vector<8x128xf32> -> vector<8x128xf32>
    %205 = arith.addf %203, %204 : vector<8x128xf32>
    %206 = arith.negf %205 : vector<8x128xf32>
    %207 = math.exp %206 : vector<8x128xf32>
    %cst_42 = arith.constant 1.000000e+00 : f32
    %208 = vector.broadcast %cst_42 : f32 to vector<8x128xf32>
    %209 = arith.addf %208, %207 : vector<8x128xf32>
    %210 = arith.divf %208, %209 : vector<8x128xf32>
    %211 = math.tanh %205 : vector<8x128xf32>
    %212 = vector.extract_strided_slice %210 {offsets = [0, 0], sizes = [8, 32], strides = [1, 1]} : vector<8x128xf32> to vector<8x32xf32>
    %213 = vector.extract_strided_slice %210 {offsets = [0, 32], sizes = [8, 32], strides = [1, 1]} : vector<8x128xf32> to vector<8x32xf32>
    %214 = vector.extract_strided_slice %211 {offsets = [0, 64], sizes = [8, 32], strides = [1, 1]} : vector<8x128xf32> to vector<8x32xf32>
    %215 = vector.extract_strided_slice %210 {offsets = [0, 96], sizes = [8, 32], strides = [1, 1]} : vector<8x128xf32> to vector<8x32xf32>
    %216 = arith.mulf %213, %202 : vector<8x32xf32>
    %217 = arith.mulf %212, %214 : vector<8x32xf32>
    %218 = arith.addf %216, %217 : vector<8x32xf32>
    %219 = math.tanh %218 : vector<8x32xf32>
    %220 = arith.mulf %215, %219 : vector<8x32xf32>
    %c8_i32 = arith.constant 8 : i32
    %221 = vector.broadcast %c8_i32 : i32 to vector<8x32xi32>
    %222 = arith.cmpi sgt, %24, %221 : vector<8x32xi32>
    %223 = arith.select %222, %220, %201 : vector<8x32xi1>, vector<8x32xf32>
    %224 = arith.select %222, %218, %202 : vector<8x32xi1>, vector<8x32xf32>
    %225 = vector.extract_strided_slice %16 {offsets = [72, 0], sizes = [8, 128], strides = [1, 1]} : vector<80x128xf32> to vector<8x128xf32>
    %cst_43 = arith.constant dense<0.000000e+00> : vector<8x128xf32>
    %226 = tpu.matmul %223, %17, %cst_43 {dimension_numbers = #tpu.dot_dimension_numbers<[1], [0], [0], [1], [0, 0, 1, 1], [], []>} : vector<8x32xf32>, vector<32x128xf32>, vector<8x128xf32> -> vector<8x128xf32>
    %227 = arith.addf %225, %226 : vector<8x128xf32>
    %228 = arith.negf %227 : vector<8x128xf32>
    %229 = math.exp %228 : vector<8x128xf32>
    %cst_44 = arith.constant 1.000000e+00 : f32
    %230 = vector.broadcast %cst_44 : f32 to vector<8x128xf32>
    %231 = arith.addf %230, %229 : vector<8x128xf32>
    %232 = arith.divf %230, %231 : vector<8x128xf32>
    %233 = math.tanh %227 : vector<8x128xf32>
    %234 = vector.extract_strided_slice %232 {offsets = [0, 0], sizes = [8, 32], strides = [1, 1]} : vector<8x128xf32> to vector<8x32xf32>
    %235 = vector.extract_strided_slice %232 {offsets = [0, 32], sizes = [8, 32], strides = [1, 1]} : vector<8x128xf32> to vector<8x32xf32>
    %236 = vector.extract_strided_slice %233 {offsets = [0, 64], sizes = [8, 32], strides = [1, 1]} : vector<8x128xf32> to vector<8x32xf32>
    %237 = vector.extract_strided_slice %232 {offsets = [0, 96], sizes = [8, 32], strides = [1, 1]} : vector<8x128xf32> to vector<8x32xf32>
    %238 = arith.mulf %235, %224 : vector<8x32xf32>
    %239 = arith.mulf %234, %236 : vector<8x32xf32>
    %240 = arith.addf %238, %239 : vector<8x32xf32>
    %241 = math.tanh %240 : vector<8x32xf32>
    %242 = arith.mulf %237, %241 : vector<8x32xf32>
    %c9_i32 = arith.constant 9 : i32
    %243 = vector.broadcast %c9_i32 : i32 to vector<8x32xi32>
    %244 = arith.cmpi sgt, %24, %243 : vector<8x32xi32>
    %245 = arith.select %244, %242, %223 : vector<8x32xi1>, vector<8x32xf32>
    %c0_45 = arith.constant 0 : index
    %c0_46 = arith.constant 0 : index
    %246 = vector.load %arg11[%c0_45, %c0_46] : memref<32x32xf32, #tpu.memory_space<vmem>>, vector<32x32xf32>
    %cst_47 = arith.constant dense<0.000000e+00> : vector<8x32xf32>
    %247 = tpu.matmul %245, %246, %cst_47 {dimension_numbers = #tpu.dot_dimension_numbers<[1], [0], [0], [1], [0, 0, 1, 1], [], []>} : vector<8x32xf32>, vector<32x32xf32>, vector<8x32xf32> -> vector<8x32xf32>
    %c0_48 = arith.constant 0 : index
    %c0_49 = arith.constant 0 : index
    %248 = vector.load %arg12[%c0_48, %c0_49] : memref<1x32xf32, #tpu.memory_space<vmem>>, vector<1x32xf32>
    %249 = vector.broadcast %248 : vector<1x32xf32> to vector<8x32xf32>
    %250 = arith.addf %247, %249 : vector<8x32xf32>
    %251 = vector.extract_strided_slice %250 {offsets = [0, 0], sizes = [8, 16], strides = [1, 1]} : vector<8x32xf32> to vector<8x16xf32>
    %252 = vector.extract_strided_slice %250 {offsets = [0, 16], sizes = [8, 16], strides = [1, 1]} : vector<8x32xf32> to vector<8x16xf32>
    %c0_50 = arith.constant 0 : index
    %c0_51 = arith.constant 0 : index
    %253 = vector.load %arg13[%c0_50, %c0_51] : memref<32x64xf32, #tpu.memory_space<vmem>>, vector<32x64xf32>
    %cst_52 = arith.constant dense<0.000000e+00> : vector<8x64xf32>
    %254 = tpu.matmul %6, %253, %cst_52 {dimension_numbers = #tpu.dot_dimension_numbers<[1], [0], [0], [1], [0, 0, 1, 1], [], []>} : vector<8x32xf32>, vector<32x64xf32>, vector<8x64xf32> -> vector<8x64xf32>
    %c0_53 = arith.constant 0 : index
    %c0_54 = arith.constant 0 : index
    %255 = vector.load %arg14[%c0_53, %c0_54] : memref<1x64xf32, #tpu.memory_space<vmem>>, vector<1x64xf32>
    %256 = vector.broadcast %255 : vector<1x64xf32> to vector<8x64xf32>
    %257 = arith.addf %254, %256 : vector<8x64xf32>
    %cst_55 = arith.constant 0.000000e+00 : f32
    %258 = vector.broadcast %cst_55 : f32 to vector<8x64xf32>
    %259 = arith.maximumf %257, %258 : vector<8x64xf32>
    %c0_56 = arith.constant 0 : index
    %c0_57 = arith.constant 0 : index
    %260 = vector.load %arg15[%c0_56, %c0_57] : memref<64x64xf32, #tpu.memory_space<vmem>>, vector<64x64xf32>
    %cst_58 = arith.constant dense<0.000000e+00> : vector<8x64xf32>
    %261 = tpu.matmul %259, %260, %cst_58 {dimension_numbers = #tpu.dot_dimension_numbers<[1], [0], [0], [1], [0, 0, 1, 1], [], []>} : vector<8x64xf32>, vector<64x64xf32>, vector<8x64xf32> -> vector<8x64xf32>
    %c0_59 = arith.constant 0 : index
    %c0_60 = arith.constant 0 : index
    %262 = vector.load %arg16[%c0_59, %c0_60] : memref<1x64xf32, #tpu.memory_space<vmem>>, vector<1x64xf32>
    %263 = vector.broadcast %262 : vector<1x64xf32> to vector<8x64xf32>
    %264 = arith.addf %261, %263 : vector<8x64xf32>
    %265 = vector.extract_strided_slice %264 {offsets = [0, 0], sizes = [8, 32], strides = [1, 1]} : vector<8x64xf32> to vector<8x32xf32>
    %266 = vector.extract_strided_slice %264 {offsets = [0, 32], sizes = [8, 32], strides = [1, 1]} : vector<8x64xf32> to vector<8x32xf32>
    %267 = arith.subf %265, %250 : vector<8x32xf32>
    %268 = arith.mulf %267, %267 : vector<8x32xf32>
    %cst_61 = arith.constant 0.000000e+00 : f32
    %269 = vector.broadcast %cst_61 : f32 to vector<8x32xf32>
    %270 = arith.subf %269, %268 : vector<8x32xf32>
    %cst_62 = arith.constant 5.000000e-01 : f32
    %271 = vector.broadcast %cst_62 : f32 to vector<8x32xf32>
    %272 = arith.mulf %270, %271 : vector<8x32xf32>
    %cst_63 = arith.constant 0.000000e+00 : f32
    %273 = vector.broadcast %cst_63 : f32 to vector<8x32xf32>
    %274 = arith.subf %273, %266 : vector<8x32xf32>
    %275 = math.exp %274 : vector<8x32xf32>
    %276 = arith.mulf %272, %275 : vector<8x32xf32>
    %cst_64 = arith.constant dense<0.000000e+00> : vector<8xf32>
    %277 = vector.multi_reduction <add>, %276, %cst_64 [1] : vector<8x32xf32> to vector<8xf32>
    %278 = vector.shape_cast %277 : vector<8xf32> to vector<8x1xf32>
    %c0_65 = arith.constant 0 : index
    %c0_66 = arith.constant 0 : index
    %279 = vector.load %arg19[%c0_65, %c0_66] : memref<64x32xf32, #tpu.memory_space<vmem>>, vector<32x32xf32>
    %cst_67 = arith.constant dense<0.000000e+00> : vector<8x32xf32>
    %280 = tpu.matmul %6, %279, %cst_67 {dimension_numbers = #tpu.dot_dimension_numbers<[1], [0], [0], [1], [0, 0, 1, 1], [], []>} : vector<8x32xf32>, vector<32x32xf32>, vector<8x32xf32> -> vector<8x32xf32>
    %c32 = arith.constant 32 : index
    %c0_68 = arith.constant 0 : index
    %281 = vector.load %arg19[%c32, %c0_68] : memref<64x32xf32, #tpu.memory_space<vmem>>, vector<32x32xf32>
    %cst_69 = arith.constant dense<0.000000e+00> : vector<8x32xf32>
    %282 = tpu.matmul %250, %281, %cst_69 {dimension_numbers = #tpu.dot_dimension_numbers<[1], [0], [0], [1], [0, 0, 1, 1], [], []>} : vector<8x32xf32>, vector<32x32xf32>, vector<8x32xf32> -> vector<8x32xf32>
    %283 = arith.addf %280, %282 : vector<8x32xf32>
    %c0_70 = arith.constant 0 : index
    %c0_71 = arith.constant 0 : index
    %284 = vector.load %arg20[%c0_70, %c0_71] : memref<1x32xf32, #tpu.memory_space<vmem>>, vector<1x32xf32>
    %285 = vector.broadcast %284 : vector<1x32xf32> to vector<8x32xf32>
    %286 = arith.addf %283, %285 : vector<8x32xf32>
    %287 = math.tanh %286 : vector<8x32xf32>
    %c0_72 = arith.constant 0 : index
    %c0_73 = arith.constant 0 : index
    %288 = vector.load %arg21[%c0_72, %c0_73] : memref<32x32xf32, #tpu.memory_space<vmem>>, vector<32x32xf32>
    %cst_74 = arith.constant dense<0.000000e+00> : vector<8x32xf32>
    %289 = tpu.matmul %287, %288, %cst_74 {dimension_numbers = #tpu.dot_dimension_numbers<[1], [0], [0], [1], [0, 0, 1, 1], [], []>} : vector<8x32xf32>, vector<32x32xf32>, vector<8x32xf32> -> vector<8x32xf32>
    %c0_75 = arith.constant 0 : index
    %c0_76 = arith.constant 0 : index
    %290 = vector.load %arg22[%c0_75, %c0_76] : memref<1x32xf32, #tpu.memory_space<vmem>>, vector<1x32xf32>
    %291 = vector.broadcast %290 : vector<1x32xf32> to vector<8x32xf32>
    %292 = arith.addf %289, %291 : vector<8x32xf32>
    %293 = math.tanh %292 : vector<8x32xf32>
    %c0_77 = arith.constant 0 : index
    %c0_78 = arith.constant 0 : index
    %294 = vector.load %arg23[%c0_77, %c0_78] : memref<1x32xf32, #tpu.memory_space<vmem>>, vector<1x32xf32>
    %295 = vector.broadcast %294 : vector<1x32xf32> to vector<8x32xf32>
    %296 = arith.mulf %293, %295 : vector<8x32xf32>
    %cst_79 = arith.constant dense<0.000000e+00> : vector<8xf32>
    %297 = vector.multi_reduction <add>, %296, %cst_79 [1] : vector<8x32xf32> to vector<8xf32>
    %298 = vector.shape_cast %297 : vector<8xf32> to vector<8x1xf32>
    %c0_80 = arith.constant 0 : index
    %c0_81 = arith.constant 0 : index
    %299 = vector.load %arg24[%c0_80, %c0_81] : memref<1x1xf32, #tpu.memory_space<vmem>>, vector<1x1xf32>
    %300 = vector.broadcast %299 : vector<1x1xf32> to vector<8x1xf32>
    %301 = arith.addf %298, %300 : vector<8x1xf32>
    %c0_82 = arith.constant 0 : index
    %c0_83 = arith.constant 0 : index
    %302 = vector.load %arg17[%c0_82, %c0_83] : memref<32x64xf32, #tpu.memory_space<vmem>>, vector<32x64xf32>
    %cst_84 = arith.constant dense<0.000000e+00> : vector<8x64xf32>
    %303 = tpu.matmul %293, %302, %cst_84 {dimension_numbers = #tpu.dot_dimension_numbers<[1], [0], [0], [1], [0, 0, 1, 1], [], []>} : vector<8x32xf32>, vector<32x64xf32>, vector<8x64xf32> -> vector<8x64xf32>
    %c0_85 = arith.constant 0 : index
    %c0_86 = arith.constant 0 : index
    %304 = vector.load %arg18[%c0_85, %c0_86] : memref<1x64xf32, #tpu.memory_space<vmem>>, vector<1x64xf32>
    %305 = vector.broadcast %304 : vector<1x64xf32> to vector<8x64xf32>
    %306 = arith.addf %303, %305 : vector<8x64xf32>
    %307 = vector.extract_strided_slice %306 {offsets = [0, 0], sizes = [8, 32], strides = [1, 1]} : vector<8x64xf32> to vector<8x32xf32>
    %308 = arith.mulf %307, %307 : vector<8x32xf32>
    %cst_87 = arith.constant dense<0.000000e+00> : vector<8xf32>
    %309 = vector.multi_reduction <add>, %308, %cst_87 [1] : vector<8x32xf32> to vector<8xf32>
    %310 = vector.shape_cast %309 : vector<8xf32> to vector<8x1xf32>
    %cst_88 = arith.constant 1.000000e-24 : f32
    %311 = vector.broadcast %cst_88 : f32 to vector<8x1xf32>
    %312 = arith.addf %310, %311 : vector<8x1xf32>
    %313 = math.rsqrt %312 : vector<8x1xf32>
    %314 = vector.broadcast %313 : vector<8x1xf32> to vector<8x32xf32>
    %315 = arith.mulf %307, %314 : vector<8x32xf32>
    %316 = arith.mulf %6, %6 : vector<8x32xf32>
    %cst_89 = arith.constant dense<0.000000e+00> : vector<8xf32>
    %317 = vector.multi_reduction <add>, %316, %cst_89 [1] : vector<8x32xf32> to vector<8xf32>
    %318 = vector.shape_cast %317 : vector<8xf32> to vector<8x1xf32>
    %cst_90 = arith.constant 1.000000e-24 : f32
    %319 = vector.broadcast %cst_90 : f32 to vector<8x1xf32>
    %320 = arith.addf %318, %319 : vector<8x1xf32>
    %321 = math.rsqrt %320 : vector<8x1xf32>
    %322 = vector.broadcast %321 : vector<8x1xf32> to vector<8x32xf32>
    %323 = arith.mulf %6, %322 : vector<8x32xf32>
    %324 = arith.mulf %323, %315 : vector<8x32xf32>
    %cst_91 = arith.constant dense<0.000000e+00> : vector<8xf32>
    %325 = vector.multi_reduction <add>, %324, %cst_91 [1] : vector<8x32xf32> to vector<8xf32>
    %326 = vector.shape_cast %325 : vector<8xf32> to vector<8x1xf32>
    %cst_92 = arith.constant dense<0.000000e+00> : vector<8x8xf32>
    %327 = tpu.matmul %323, %315, %cst_92 {dimension_numbers = #tpu.dot_dimension_numbers<[1], [1], [0], [0], [0, 0, 1, 0], [], []>} : vector<8x32xf32>, vector<8x32xf32>, vector<8x8xf32> -> vector<8x8xf32>
    %cst_93 = arith.constant dense<0xFF800000> : vector<8xf32>
    %328 = vector.multi_reduction <maximumf>, %327, %cst_93 [1] : vector<8x8xf32> to vector<8xf32>
    %329 = vector.shape_cast %328 : vector<8xf32> to vector<8x1xf32>
    %330 = vector.broadcast %329 : vector<8x1xf32> to vector<8x8xf32>
    %331 = arith.subf %327, %330 : vector<8x8xf32>
    %332 = math.exp %331 : vector<8x8xf32>
    %cst_94 = arith.constant dense<0.000000e+00> : vector<8xf32>
    %333 = vector.multi_reduction <add>, %332, %cst_94 [1] : vector<8x8xf32> to vector<8xf32>
    %334 = vector.shape_cast %333 : vector<8xf32> to vector<8x1xf32>
    %335 = math.log %334 : vector<8x1xf32>
    %336 = arith.addf %335, %329 : vector<8x1xf32>
    %337 = arith.subf %326, %336 : vector<8x1xf32>
    %338 = vector.extract_strided_slice %306 {offsets = [0, 32], sizes = [8, 16], strides = [1, 1]} : vector<8x64xf32> to vector<8x16xf32>
    %339 = arith.mulf %338, %338 : vector<8x16xf32>
    %cst_95 = arith.constant dense<0.000000e+00> : vector<8xf32>
    %340 = vector.multi_reduction <add>, %339, %cst_95 [1] : vector<8x16xf32> to vector<8xf32>
    %341 = vector.shape_cast %340 : vector<8xf32> to vector<8x1xf32>
    %cst_96 = arith.constant 1.000000e-24 : f32
    %342 = vector.broadcast %cst_96 : f32 to vector<8x1xf32>
    %343 = arith.addf %341, %342 : vector<8x1xf32>
    %344 = math.rsqrt %343 : vector<8x1xf32>
    %345 = vector.broadcast %344 : vector<8x1xf32> to vector<8x16xf32>
    %346 = arith.mulf %338, %345 : vector<8x16xf32>
    %347 = arith.mulf %252, %252 : vector<8x16xf32>
    %cst_97 = arith.constant dense<0.000000e+00> : vector<8xf32>
    %348 = vector.multi_reduction <add>, %347, %cst_97 [1] : vector<8x16xf32> to vector<8xf32>
    %349 = vector.shape_cast %348 : vector<8xf32> to vector<8x1xf32>
    %cst_98 = arith.constant 1.000000e-24 : f32
    %350 = vector.broadcast %cst_98 : f32 to vector<8x1xf32>
    %351 = arith.addf %349, %350 : vector<8x1xf32>
    %352 = math.rsqrt %351 : vector<8x1xf32>
    %353 = vector.broadcast %352 : vector<8x1xf32> to vector<8x16xf32>
    %354 = arith.mulf %252, %353 : vector<8x16xf32>
    %355 = arith.mulf %354, %346 : vector<8x16xf32>
    %cst_99 = arith.constant dense<0.000000e+00> : vector<8xf32>
    %356 = vector.multi_reduction <add>, %355, %cst_99 [1] : vector<8x16xf32> to vector<8xf32>
    %357 = vector.shape_cast %356 : vector<8xf32> to vector<8x1xf32>
    %cst_100 = arith.constant dense<0.000000e+00> : vector<8x8xf32>
    %358 = tpu.matmul %354, %346, %cst_100 {dimension_numbers = #tpu.dot_dimension_numbers<[1], [1], [0], [0], [0, 0, 1, 0], [], []>} : vector<8x16xf32>, vector<8x16xf32>, vector<8x8xf32> -> vector<8x8xf32>
    %cst_101 = arith.constant dense<0xFF800000> : vector<8xf32>
    %359 = vector.multi_reduction <maximumf>, %358, %cst_101 [1] : vector<8x8xf32> to vector<8xf32>
    %360 = vector.shape_cast %359 : vector<8xf32> to vector<8x1xf32>
    %361 = vector.broadcast %360 : vector<8x1xf32> to vector<8x8xf32>
    %362 = arith.subf %358, %361 : vector<8x8xf32>
    %363 = math.exp %362 : vector<8x8xf32>
    %cst_102 = arith.constant dense<0.000000e+00> : vector<8xf32>
    %364 = vector.multi_reduction <add>, %363, %cst_102 [1] : vector<8x8xf32> to vector<8xf32>
    %365 = vector.shape_cast %364 : vector<8xf32> to vector<8x1xf32>
    %366 = math.log %365 : vector<8x1xf32>
    %367 = arith.addf %366, %360 : vector<8x1xf32>
    %368 = arith.subf %357, %367 : vector<8x1xf32>
    %369 = vector.extract_strided_slice %306 {offsets = [0, 48], sizes = [8, 16], strides = [1, 1]} : vector<8x64xf32> to vector<8x16xf32>
    %370 = arith.mulf %369, %369 : vector<8x16xf32>
    %cst_103 = arith.constant dense<0.000000e+00> : vector<8xf32>
    %371 = vector.multi_reduction <add>, %370, %cst_103 [1] : vector<8x16xf32> to vector<8xf32>
    %372 = vector.shape_cast %371 : vector<8xf32> to vector<8x1xf32>
    %cst_104 = arith.constant 1.000000e-24 : f32
    %373 = vector.broadcast %cst_104 : f32 to vector<8x1xf32>
    %374 = arith.addf %372, %373 : vector<8x1xf32>
    %375 = math.rsqrt %374 : vector<8x1xf32>
    %376 = vector.broadcast %375 : vector<8x1xf32> to vector<8x16xf32>
    %377 = arith.mulf %369, %376 : vector<8x16xf32>
    %378 = arith.mulf %251, %251 : vector<8x16xf32>
    %cst_105 = arith.constant dense<0.000000e+00> : vector<8xf32>
    %379 = vector.multi_reduction <add>, %378, %cst_105 [1] : vector<8x16xf32> to vector<8xf32>
    %380 = vector.shape_cast %379 : vector<8xf32> to vector<8x1xf32>
    %cst_106 = arith.constant 1.000000e-24 : f32
    %381 = vector.broadcast %cst_106 : f32 to vector<8x1xf32>
    %382 = arith.addf %380, %381 : vector<8x1xf32>
    %383 = math.rsqrt %382 : vector<8x1xf32>
    %384 = vector.broadcast %383 : vector<8x1xf32> to vector<8x16xf32>
    %385 = arith.mulf %251, %384 : vector<8x16xf32>
    %386 = arith.mulf %385, %377 : vector<8x16xf32>
    %cst_107 = arith.constant dense<0.000000e+00> : vector<8xf32>
    %387 = vector.multi_reduction <add>, %386, %cst_107 [1] : vector<8x16xf32> to vector<8xf32>
    %388 = vector.shape_cast %387 : vector<8xf32> to vector<8x1xf32>
    %cst_108 = arith.constant dense<0.000000e+00> : vector<8x8xf32>
    %389 = tpu.matmul %385, %377, %cst_108 {dimension_numbers = #tpu.dot_dimension_numbers<[1], [1], [0], [0], [0, 0, 1, 0], [], []>} : vector<8x16xf32>, vector<8x16xf32>, vector<8x8xf32> -> vector<8x8xf32>
    %cst_109 = arith.constant dense<0xFF800000> : vector<8xf32>
    %390 = vector.multi_reduction <maximumf>, %389, %cst_109 [1] : vector<8x8xf32> to vector<8xf32>
    %391 = vector.shape_cast %390 : vector<8xf32> to vector<8x1xf32>
    %392 = vector.broadcast %391 : vector<8x1xf32> to vector<8x8xf32>
    %393 = arith.subf %389, %392 : vector<8x8xf32>
    %394 = math.exp %393 : vector<8x8xf32>
    %cst_110 = arith.constant dense<0.000000e+00> : vector<8xf32>
    %395 = vector.multi_reduction <add>, %394, %cst_110 [1] : vector<8x8xf32> to vector<8xf32>
    %396 = vector.shape_cast %395 : vector<8xf32> to vector<8x1xf32>
    %397 = math.log %396 : vector<8x1xf32>
    %398 = arith.addf %397, %391 : vector<8x1xf32>
    %399 = arith.subf %388, %398 : vector<8x1xf32>
    %cst_111 = arith.constant 0.000000e+00 : f32
    %400 = vector.broadcast %cst_111 : f32 to vector<8x27xf32>
    %401 = tpu.concatenate %6, %250, %293, %301, %278, %337, %368, %399, %400 in 1 : vector<8x32xf32>, vector<8x32xf32>, vector<8x32xf32>, vector<8x1xf32>, vector<8x1xf32>, vector<8x1xf32>, vector<8x1xf32>, vector<8x1xf32>, vector<8x27xf32> -> vector<8x128xf32>
    %c0_112 = arith.constant 0 : index
    %c0_113 = arith.constant 0 : index
    %402 = vector.load %arg25[%c0_112, %c0_113] : memref<8x128xf32, #tpu.memory_space<vmem>>, vector<8x128xf32>
    tpu.vector_store %arg25[%c0_112, %c0_113], %401 {strides = array<i32>} : memref<8x128xf32, #tpu.memory_space<vmem>>, vector<8x128xf32>,
    return
  }
}

</mosaic_0001>

<bundles_post_ra>
// kernel: mmim_forward.1
= control target key start
LH: loop header
LB: loop body
LE: loop exit
PB: predicated region body
PF: predicated region fallthrough
CT: control target
= control target key end

     0   :  { %s4449_s0 = inlined_call_operand.vmem [shape: f32[8,12], index: 0, kind: input, shape index: {}]   ;;  %s4450_s1 = inlined_call_operand.vmem [shape: s32[8,1], index: 1, kind: input, shape index: {}]   ;;  %s4451_s2 = inlined_call_operand.vmem [shape: s32[8,1], index: 2, kind: input, shape index: {}]   ;;  %s4452_s3 = inlined_call_operand.vmem [shape: f32[80,16], index: 3, kind: input, shape index: {}]   ;;  %s4453_s4 = inlined_call_operand.vmem [shape: f32[80,24], index: 4, kind: input, shape index: {}]   ;;  %s4454_s5 = inlined_call_operand.hbm [shape: f32[12,32], index: 5, kind: input, shape index: {}]   ;;  %s4455_s6 = inlined_call_operand.vmem [shape: f32[1,32], index: 6, kind: input, shape index: {}]   ;;  %s4456_s7 = inlined_call_operand.hbm [shape: f32[16,128], index: 7, kind: input, shape index: {}]   ;;  %s4457_s8 = inlined_call_operand.hbm [shape: f32[24,128], index: 8, kind: input, shape index: {}]   ;;  %s4458_s9 = inlined_call_operand.hbm [shape: f32[32,128], index: 9, kind: input, shape index: {}]   ;;  %s4459_s10 = inlined_call_operand.hbm [shape: f32[1,128], index: 10, kind: input, shape index: {}]   ;;  %s4460_s11 = inlined_call_operand.hbm [shape: f32[32,32], index: 11, kind: input, shape index: {}]   ;;  %s4461_s12 = inlined_call_operand.vmem [shape: f32[1,32], index: 12, kind: input, shape index: {}]   ;;  %s4462_s13 = inlined_call_operand.hbm [shape: f32[32,64], index: 13, kind: input, shape index: {}]   ;;  %s4463_s14 = inlined_call_operand.hbm [shape: f32[1,64], index: 14, kind: input, shape index: {}]   ;;  %s4464_s15 = inlined_call_operand.hbm [shape: f32[64,64], index: 15, kind: input, shape index: {}]   ;;  %s4465_s16 = inlined_call_operand.hbm [shape: f32[1,64], index: 16, kind: input, shape index: {}]   ;;  %s4466_s17 = inlined_call_operand.hbm [shape: f32[32,64], index: 17, kind: input, shape index: {}]   ;;  %s4467_s18 = inlined_call_operand.vmem [shape: f32[1,64], index: 18, kind: input, shape index: {}]   ;;  %s4468_s19 = inlined_call_operand.vmem [shape: f32[64,32], index: 19, kind: input, shape index: {}]   ;;  %s4469_s20 = inlined_call_operand.hbm [shape: f32[1,32], index: 20, kind: input, shape index: {}]   ;;  %s4470_s21 = inlined_call_operand.hbm [shape: f32[32,32], index: 21, kind: input, shape index: {}]   ;;  %s4471_s22 = inlined_call_operand.hbm [shape: f32[1,32], index: 22, kind: input, shape index: {}]   ;;  %s4472_s23 = inlined_call_operand.hbm [shape: f32[1,32], index: 23, kind: input, shape index: {}]   ;;  %s4473_s24 = inlined_call_operand.<no memory space> [shape: f32[1,1], index: 24, kind: input, shape index: {}]   ;;  %s4474_s25 = inlined_call_operand.vmem [shape: f32[8,128], index: 25, kind: output, shape index: {}]  }
   0x1   :  { %4477 = sst [smem:[#allocation34_spill]] %s4449_s0  ;;  %v30_v0 = vstv %s4473_s24 }
   0x2   :  { %4478 = sst [smem:[#allocation35_spill]] %s4450_s1  ;;  %31 = vst [vmem:[#allocation2] sm:$0x1] %v30_v0 }
   0x3   :  { %4479 = sst [smem:[#allocation36_spill]] %s4451_s2 }
   0x4   :  { %4480 = sst [smem:[#allocation37_spill]] %s4452_s3 }
   0x5   :  { %4481 = sst [smem:[#allocation38_spill]] %s4453_s4 }
   0x6   :  { %4482 = sst [smem:[#allocation39_spill]] %s4454_s5 }
   0x7   :  { %4483 = sst [smem:[#allocation40_spill]] %s4455_s6 }
   0x8   :  { %4484 = sst [smem:[#allocation41_spill]] %s4456_s7 }
   0x9   :  { %4485 = sst [smem:[#allocation42_spill]] %s4457_s8 }
   0xa   :  { %4486 = sst [smem:[#allocation43_spill]] %s4458_s9 }
   0xb   :  { %32 = vsyncpa [#allocation4], 0 }
   0xc   :  { %33 = vsyncpa [#allocation6], 0 }
   0xd   :  { %34 = vsyncpa [#allocation9], 0 }
   0xe   :  { %35 = vsyncpa [#allocation12], 0 }
   0xf   :  { %36 = vsyncpa [#allocation15], 0 }
  0x10   :  { %37 = vsyncpa [#allocation18], 0 }
  0x11   :  { %38 = vsyncpa [#allocation21], 0 }
  0x12   :  { %39 = vsyncpa [#allocation24], 0  ;;  %s3732_s6 = smov [#allocation5]   ;;  %s3733_s7 = smov [#allocation8]  }
  0x13   :  { %s69_s30 = sshll.u32 %s3732_s6, 4  ;;  %s93_s3 = sshll.u32 %s3733_s7, 4  ;;  %s70_s30 = int_to_ptr.vmem [resolvable:$true] %s69_s30  ;;  %s94_s3 = int_to_ptr.vmem [resolvable:$true] %s93_s3 }
  0x14   :  { %s3424_s26 = scalar_lea.vmem %s70_s30, 256  ;;  %p3429_p1 = scmp.lt.s32.totalorder %s70_s30, %s70_s30 }
  0x15   :  { %p3425_p0 = scmp.ne.s32.totalorder %s70_s30, %s3424_s26  ;;  %p3430_p2 = scmp.lt.s32.totalorder %s3424_s26, %s3424_s26 }
  0x17   :  { %p3431_p3 = por %p3430_p2, %p3429_p1 }
  0x19   :  { %p3432_p4 = pnand %p3431_p3, %p3425_p0 }
  0x1b   :  { %3435 = shalt.err (!%p3432_p4)
}
  0x1c   :  { %s3734_s24 = smov 128   ;;  %s3735_s1 = smov 8  }
  0x1d   :  { %s4487_s4 = sld [smem:[#allocation41_spill]]  ;;  %s3444_s28 = scalar_lea.vmem %s94_s3, 512 }
  0x1e   :  { %p3445_p5 = scmp.ne.s32.totalorder %s94_s3, %s3444_s28  ;;  %p3449_p6 = scmp.lt.s32.totalorder %s94_s3, %s94_s3 }
  0x1f   :  { %p3450_p7 = scmp.lt.s32.totalorder %s3444_s28, %s3444_s28 }
  0x21   :  { %p3451_p8 = por %p3450_p7, %p3449_p6 }
  0x23   :  { %75 = dma.hbm_to_vmem [thread:$0]  %s4487_s4, 256, %s70_s30, [#allocation6], %s3734_s24, %s3734_s24, %s3735_s1  }
  0x24   :  { %p3452_p9 = pnand %p3451_p8, %p3445_p5 }
  0x26   :  { %3455 = shalt.err (!%p3452_p9)
}
  0x27   :  { %s4488_s0 = sld [smem:[#allocation43_spill]]  ;;  %s3736_s29 = smov [#allocation11]  }
  0x28   :  { %s115_s2 = sshll.u32 %s3736_s29, 4  ;;  %s3737_s6 = smov [#allocation14]   ;;  %s116_s2 = int_to_ptr.vmem [resolvable:$true] %s115_s2 }
  0x29   :  { %s142_s7 = sshll.u32 %s3737_s6, 4  ;;  %s3464_s30 = scalar_lea.vmem %s116_s2, 512  ;;  %s143_s7 = int_to_ptr.vmem [resolvable:$true] %s142_s7 }
  0x2a   :  { %p3465_p10 = scmp.ne.s32.totalorder %s116_s2, %s3464_s30  ;;  %p3469_p11 = scmp.lt.s32.totalorder %s116_s2, %s116_s2 }
  0x2b   :  { %p3470_p12 = scmp.lt.s32.totalorder %s3464_s30, %s3464_s30 }
  0x2d   :  { %99 = dma.hbm_to_vmem [thread:$0]  %s4488_s0, 512, %s94_s3, [#allocation9], %s3734_s24, %s3734_s24, %s3735_s1  }
  0x2e   :  { %p3471_p13 = por %p3470_p12, %p3469_p11 }
  0x30   :  { %p3472_p0 = pnand %p3471_p13, %p3465_p10 }
  0x32   :  { %3475 = shalt.err (!%p3472_p0)
}
  0x33   :  { %121 = dma.hbm_to_vmem [thread:$0]  %s4460_s11, 512, %s116_s2, [#allocation12], %s3734_s24, %s3734_s24, %s3735_s1  }
  0x34   :  { %s3484_s3 = scalar_lea.vmem %s143_s7, 16  ;;  %s3488_s27 = scalar_lea.vmem %s143_s7, 32 }
  0x35   :  { %p3485_p1 = scmp.ne.s32.totalorder %s143_s7, %s3484_s3  ;;  %p3489_p2 = scmp.lt.s32.totalorder %s143_s7, %s143_s7 }
  0x36   :  { %p3490_p3 = scmp.lt.s32.totalorder %s3488_s27, %s3484_s3 }
  0x38   :  { %p3491_p4 = por %p3490_p3, %p3489_p2 }
  0x3a   :  { %p3492_p5 = pnand %p3491_p4, %p3485_p1 }
  0x3c   :  { %3495 = shalt.err (!%p3492_p5)
}
  0x3d   :  { %145 = dma.hbm_to_vmem [thread:$0]  %s4463_s14, 16, %s143_s7, [#allocation15]  }
  0x3e   :  { %s3738_s9 = smov [#allocation17]   ;;  %s3739_s0 = smov [#allocation20]  }
  0x3f   :  { %s164_s5 = sshll.u32 %s3738_s9, 4  ;;  %s190_s29 = sshll.u32 %s3739_s0, 4  ;;  %s165_s5 = int_to_ptr.vmem [resolvable:$true] %s164_s5  ;;  %s191_s29 = int_to_ptr.vmem [resolvable:$true] %s190_s29 }
  0x40   :  { %s3504_s6 = scalar_lea.vmem %s165_s5, 16  ;;  %s3508_s11 = scalar_lea.vmem %s165_s5, 32 }
  0x41   :  { %p3505_p6 = scmp.ne.s32.totalorder %s165_s5, %s3504_s6  ;;  %p3509_p7 = scmp.lt.s32.totalorder %s165_s5, %s165_s5 }
  0x42   :  { %p3510_p8 = scmp.lt.s32.totalorder %s3508_s11, %s3504_s6 }
  0x44   :  { %p3511_p9 = por %p3510_p8, %p3509_p7 }
  0x46   :  { %p3512_p10 = pnand %p3511_p9, %p3505_p6 }
  0x48   :  { %3515 = shalt.err (!%p3512_p10)
}
  0x49   :  { %167 = dma.hbm_to_vmem [thread:$0]  %s4465_s16, 16, %s165_s5, [#allocation18]  }
  0x4a   :  { %s3524_s26 = scalar_lea.vmem %s191_s29, 16  ;;  %s3528_s14 = scalar_lea.vmem %s191_s29, 32 }
  0x4b   :  { %p3525_p11 = scmp.ne.s32.totalorder %s191_s29, %s3524_s26  ;;  %p3529_p12 = scmp.lt.s32.totalorder %s191_s29, %s191_s29 }
  0x4c   :  { %p3530_p13 = scmp.lt.s32.totalorder %s3528_s14, %s3524_s26 }
  0x4e   :  { %p3531_p0 = por %p3530_p13, %p3529_p12 }
  0x50   :  { %p3532_p1 = pnand %p3531_p0, %p3525_p11 }
  0x52   :  { %3535 = shalt.err (!%p3532_p1)
}
  0x53   :  { %193 = dma.hbm_to_vmem [thread:$0]  %s4469_s20, 16, %s191_s29, [#allocation21]  }
  0x54   :  { %s3740_s3 = smov [#allocation23]   ;;  %s3741_s4 = smov [#allocation3]  }
  0x55   :  { %s212_s27 = sshll.u32 %s3740_s3, 4  ;;  %s55_s28 = sshll.u32 %s3741_s4, 4  ;;  %s213_s27 = int_to_ptr.vmem [resolvable:$true] %s212_s27  ;;  %s56_s28 = int_to_ptr.vmem [resolvable:$true] %s55_s28 }
  0x56   :  { %s3544_s9 = scalar_lea.vmem %s213_s27, 16  ;;  %s3548_s16 = scalar_lea.vmem %s213_s27, 32 }
  0x57   :  { %p3545_p2 = scmp.ne.s32.totalorder %s213_s27, %s3544_s9  ;;  %p3549_p3 = scmp.lt.s32.totalorder %s213_s27, %s213_s27 }
  0x58   :  { %p3550_p4 = scmp.lt.s32.totalorder %s3548_s16, %s3544_s9 }
  0x5a   :  { %p3551_p5 = por %p3550_p4, %p3549_p3 }
  0x5c   :  { %p3552_p6 = pnand %p3551_p5, %p3545_p2 }
  0x5e   :  { %3555 = shalt.err (!%p3552_p6)
}
  0x5f   :  { %215 = dma.hbm_to_vmem [thread:$0]  %s4471_s22, 16, %s213_s27, [#allocation24]  }
  0x60   :  { %s3564_s6 = scalar_lea.vmem %s56_s28, 256  ;;  %p3569_p8 = scmp.lt.s32.totalorder %s56_s28, %s56_s28 }
  0x61   :  { %p3565_p7 = scmp.ne.s32.totalorder %s56_s28, %s3564_s6  ;;  %p3570_p9 = scmp.lt.s32.totalorder %s3564_s6, %s3564_s6 }
  0x63   :  { %p3571_p10 = por %p3570_p9, %p3569_p8 }
  0x65   :  { %p3572_p11 = pnand %p3571_p10, %p3565_p7 }
  0x67   :  { %3575 = shalt.err (!%p3572_p11)
}
  0x68   :  { %s4489_s11 = sld [smem:[#allocation39_spill]]  ;;  %s3742_s2 = smov [#allocation7]  }
  0x69   :  { %s81_s30 = sshll.u32 %s3742_s2, 4  ;;  %s3743_s26 = smov [#allocation10]   ;;  %s82_s30 = int_to_ptr.vmem [resolvable:$true] %s81_s30 }
  0x6a   :  { %s106_s14 = sshll.u32 %s3743_s26, 4  ;;  %s3584_s22 = scalar_lea.vmem %s82_s30, 384  ;;  %s107_s14 = int_to_ptr.vmem [resolvable:$true] %s106_s14 }
  0x6b   :  { %p3585_p12 = scmp.ne.s32.totalorder %s82_s30, %s3584_s22  ;;  %p3589_p13 = scmp.lt.s32.totalorder %s82_s30, %s82_s30 }
  0x6c   :  { %p3590_p0 = scmp.lt.s32.totalorder %s3584_s22, %s3584_s22 }
  0x6e   :  { %61 = dma.hbm_to_vmem [thread:$0]  %s4489_s11, 256, %s56_s28, [#allocation4], %s3734_s24, %s3734_s24, %s3735_s1  }
  0x6f   :  { %p3591_p1 = por %p3590_p0, %p3589_p13 }
  0x71   :  { %p3592_p2 = pnand %p3591_p1, %p3585_p12 }
  0x73   :  { %3595 = shalt.err (!%p3592_p2)
}
  0x74   :  { %s4490_s3 = sld [smem:[#allocation42_spill]]  ;;  %s3604_s27 = scalar_lea.vmem %s107_s14, 16 }
  0x75   :  { %p3605_p3 = scmp.ne.s32.totalorder %s107_s14, %s3604_s27  ;;  %s3608_s4 = scalar_lea.vmem %s107_s14, 32 }
  0x76   :  { %p3609_p4 = scmp.lt.s32.totalorder %s107_s14, %s107_s14  ;;  %p3610_p5 = scmp.lt.s32.totalorder %s3608_s4, %s3604_s27 }
  0x78   :  { %p3611_p6 = por %p3610_p5, %p3609_p4 }
  0x7a   :  { %87 = dma.hbm_to_vmem [thread:$0]  %s4490_s3, 384, %s82_s30, [#allocation6], %s3734_s24, %s3734_s24, %s3735_s1  }
  0x7b   :  { %p3612_p7 = pnand %p3611_p6, %p3605_p3 }
  0x7d   :  { %3615 = shalt.err (!%p3612_p7)
}
  0x7e   :  { %109 = dma.hbm_to_vmem [thread:$0]  %s4459_s10, 16, %s107_s14, [#allocation9]  }
  0x7f   :  { %s3744_s16 = smov [#allocation13]   ;;  %s3745_s0 = smov [#allocation16]  }
  0x80   :  { %s129_s5 = sshll.u32 %s3744_s16, 4  ;;  %s151_s6 = sshll.u32 %s3745_s0, 4  ;;  %s130_s5 = int_to_ptr.vmem [resolvable:$true] %s129_s5  ;;  %s152_s6 = int_to_ptr.vmem [resolvable:$true] %s151_s6 }
  0x81   :  { %s3624_s20 = scalar_lea.vmem %s130_s5, 512  ;;  %p3629_p9 = scmp.lt.s32.totalorder %s130_s5, %s130_s5 }
  0x82   :  { %p3625_p8 = scmp.ne.s32.totalorder %s130_s5, %s3624_s20  ;;  %p3630_p10 = scmp.lt.s32.totalorder %s3624_s20, %s3624_s20 }
  0x84   :  { %p3631_p11 = por %p3630_p10, %p3629_p9 }
  0x86   :  { %p3632_p12 = pnand %p3631_p11, %p3625_p8 }
  0x88   :  { %3635 = shalt.err (!%p3632_p12)
}
  0x89   :  { %135 = dma.hbm_to_vmem [thread:$0]  %s4462_s13, 512, %s130_s5, [#allocation12], %s3734_s24, %s3734_s24, %s3735_s1  }
  0x8a   :  { %s3644_s10 = scalar_lea.vmem %s152_s6, 1024  ;;  %p3649_p0 = scmp.lt.s32.totalorder %s152_s6, %s152_s6 }
  0x8b   :  { %p3645_p13 = scmp.ne.s32.totalorder %s152_s6, %s3644_s10  ;;  %p3650_p1 = scmp.lt.s32.totalorder %s3644_s10, %s3644_s10 }
  0x8d   :  { %p3651_p2 = por %p3650_p1, %p3649_p0 }
  0x8f   :  { %p3652_p3 = pnand %p3651_p2, %p3645_p13 }
  0x91   :  { %3655 = shalt.err (!%p3652_p3)
}
  0x92   :  { %157 = dma.hbm_to_vmem [thread:$0]  %s4464_s15, 1024, %s152_s6, [#allocation15], %s3734_s24, %s3734_s24, %s3735_s1  }
  0x93   :  { %s3746_s26 = smov [#allocation19]   ;;  %s3747_s22 = smov [#allocation22]  }
  0x94   :  { %s173_s14 = sshll.u32 %s3746_s26, 4  ;;  %s199_s7 = sshll.u32 %s3747_s22, 4  ;;  %s174_s14 = int_to_ptr.vmem [resolvable:$true] %s173_s14  ;;  %s200_s7 = int_to_ptr.vmem [resolvable:$true] %s199_s7 }
  0x95   :  { %s3664_s13 = scalar_lea.vmem %s174_s14, 512  ;;  %p3669_p5 = scmp.lt.s32.totalorder %s174_s14, %s174_s14 }
  0x96   :  { %p3665_p4 = scmp.ne.s32.totalorder %s174_s14, %s3664_s13  ;;  %p3670_p6 = scmp.lt.s32.totalorder %s3664_s13, %s3664_s13 }
  0x98   :  { %p3671_p7 = por %p3670_p6, %p3669_p5 }
  0x9a   :  { %p3672_p8 = pnand %p3671_p7, %p3665_p4 }
  0x9c   :  { %3675 = shalt.err (!%p3672_p8)
}
  0x9d   :  { %179 = dma.hbm_to_vmem [thread:$0]  %s4466_s17, 512, %s174_s14, [#allocation18], %s3734_s24, %s3734_s24, %s3735_s1  }
  0x9e   :  { %s3684_s15 = scalar_lea.vmem %s200_s7, 512  ;;  %p3689_p10 = scmp.lt.s32.totalorder %s200_s7, %s200_s7 }
  0x9f   :  { %p3685_p9 = scmp.ne.s32.totalorder %s200_s7, %s3684_s15  ;;  %p3690_p11 = scmp.lt.s32.totalorder %s3684_s15, %s3684_s15 }
  0xa1   :  { %p3691_p12 = por %p3690_p11, %p3689_p10 }
  0xa3   :  { %p3692_p13 = pnand %p3691_p12, %p3685_p9 }
  0xa5   :  { %3695 = shalt.err (!%p3692_p13)
}
  0xa6   :  { %205 = dma.hbm_to_vmem [thread:$0]  %s4470_s21, 512, %s200_s7, [#allocation21], %s3734_s24, %s3734_s24, %s3735_s1  }
  0xa7   :  { %s3748_s28 = smov [#allocation25]  }
  0xa8   :  { %s222_s9 = sshll.u32 %s3748_s28, 4  ;;  %s223_s9 = int_to_ptr.vmem [resolvable:$true] %s222_s9 }
  0xa9   :  { %s3704_s16 = scalar_lea.vmem %s223_s9, 16  ;;  %s3708_s17 = scalar_lea.vmem %s223_s9, 32 }
  0xaa   :  { %p3705_p0 = scmp.ne.s32.totalorder %s223_s9, %s3704_s16  ;;  %p3709_p1 = scmp.lt.s32.totalorder %s223_s9, %s223_s9 }
  0xab   :  { %p3710_p2 = scmp.lt.s32.totalorder %s3708_s17, %s3704_s16 }
  0xad   :  { %p3711_p3 = por %p3710_p2, %p3709_p1 }
  0xaf   :  { %p3712_p4 = pnand %p3711_p3, %p3705_p0 }
  0xb1   :  { %3715 = shalt.err (!%p3712_p4)
}
  0xb2   :  { %225 = dma.hbm_to_vmem [thread:$0]  %s4472_s23, 16, %s223_s9, [#allocation24]  }
  0xb3   :  { %3716 = dma.done.wait [#allocation4], 256  }
  0xb4   :  { %3717 = vsyncadd [#allocation4], 4294967040 }
  0xb5   :  { %3718 = dma.done.wait [#allocation6], 640  }
  0xb6   :  { %3719 = vsyncadd [#allocation6], 4294966656 }
  0xb7   :  { %3720 = dma.done.wait [#allocation9], 528  }
  0xb8   :  { %3721 = vsyncadd [#allocation9], 4294966768 }
  0xb9   :  { %3722 = dma.done.wait [#allocation12], 1024  }
  0xba   :  { %3723 = vsyncadd [#allocation12], 4294966272 }
  0xbb   :  { %3724 = dma.done.wait [#allocation15], 1040  }
  0xbc   :  { %3725 = vsyncadd [#allocation15], 4294966256 }
  0xbd   :  { %3726 = dma.done.wait [#allocation18], 528  }
  0xbe   :  { %3727 = vsyncadd [#allocation18], 4294966768 }
  0xbf   :  { %3728 = dma.done.wait [#allocation21], 528  }
  0xc0   :  { %3729 = vsyncadd [#allocation21], 4294966768 }
  0xc1   :  { %3730 = dma.done.wait [#allocation24], 32  }
  0xc2   :  { %3731 = vsyncadd [#allocation24], 4294967264  ;;  %v3749_v1 = vmov 0.0   ;;  %vm3750_vm0 = vmmov 0   ;;  %vm287_vm1 = vcmask 1043456   ;;  %v386_v3 = vld [vmem:[#allocation7 + $0x10] sm:$0xff] }
  0xc3   :  { %3020 = vmatprep.subr.mxu0 %v3749_v1  ;;  %3024 = vmatprep.mubr.msk.f32.mxu0 %vm3750_vm0, %v3749_v1  ;;  %v275_v2 = vld [vmem:[#allocation3 + $0x8] sm:$0xf]  ;;  %v274_v4 = vld [vmem:[#allocation3] sm:$0xff]  ;;  %s4491_s24 = sld [smem:[#allocation34_spill]]  ;;  %vm283_vm2 = vcmask 97280   ;;  %v373_v7 = vld [vmem:[#allocation5 + $0x8] sm:$0xff] }
  0xc4   :  { %3021 = vmatpush3.msk.msra.mxu0 %vm287_vm1, %v275_v2  ;;  %3027 = vmatprep.subr.mxu1 %v386_v3  ;;  %v385_v5 = vld [vmem:[#allocation7 + $0x8] sm:$0xff]  ;;  %v384_v8 = vld [vmem:[#allocation7] sm:$0xff]  ;;  %s4492_s20 = sld [smem:[#allocation38_spill]]  ;;  %vm387_vm3 = vcmask 195584   ;;  %v372_v10 = vld [vmem:[#allocation5] sm:$0xff]  ;;  %vm533_vm4 = vcmask 130048  }
  0xc5   :  { %3022 = vmatprep.subr.mxu0 %v3749_v1  ;;  %3028 = vmatpush3.msra.mxu1 %v386_v3  ;;  %s4493_s30 = sld [smem:[#allocation37_spill]]  ;;  %v3982_v14 = vld [vmem:[#allocation8 + $0x18] sm:$0xff]  ;;  %v3998_v18 = vld [vmem:[#allocation8 + $0x10] sm:$0xff]  ;;  %v4013_v22 = vld [vmem:[#allocation8 + $0x8] sm:$0xff]  ;;  %s3754_s0 = smov 96   ;;  %vm709_vm6 = vcmask 261120  }
  0xc6   :  { %3023 = vmatpush3.msra.mxu0 %v274_v4  ;;  %3029 = vmatprep.subr.mxu1 %v385_v5  ;;  %v4025_v25 = vld [vmem:[#allocation8] sm:$0xff]  ;;  %s4494_s9 = sld [smem:[#allocation36_spill]]  ;;  %vm2015_vm1 = vcmask 523264   ;;  %s3755_s16 = smov 80  }
  0xc7   :  { %3030 = vmatpush3.msra.mxu1 %v385_v5  ;;  %3048 = vmatprep.subr.mxu0 %v373_v7  ;;  %v2856_v39 = vld [vmem:[#allocation10] ss:$0 sm:$0xff]  ;;  %s4495_s5 = sld [smem:[#allocation35_spill]]  ;;  %s3756_s17 = smov 112  }
  0xc8   :  { %3031 = vmatprep.subr.mxu1 %v384_v8 }
  0xc9   :  { %v273_v6 = vld [vmem:[%s4491_s24] sm:$0xff]  ;;  %3032 = vmatpush3.msra.mxu1 %v384_v8  ;;  %s4496_s24 = sld [smem:[#allocation40_spill]] }
  0xca   :  { %3025 = vmatmul.mubr.msk.f32.vlgmr.msra.gmra.mxu0 %vm283_vm2, %v273_v6  ;;  %v374_v9 = vld [vmem:[%s4492_s20] sm:$0xff]  ;;  %v375_v11 = vld [vmem:[%s4492_s20 + $0x8] sm:$0xff]  ;;  %v376_v15 = vld [vmem:[%s4492_s20 + $0x10] sm:$0xff]  ;;  %3067 = vmatprep.subr.mxu1 %v3749_v1  ;;  %vm2546_vm2 = vcmask 64512  }
  0xcb   :  { %3049 = vmatpush3.msra.mxu0 %v373_v7  ;;  %v362_v12 = vld [vmem:[%s4493_s30] sm:$0xff]  ;;  %3033 = vmatprep.mubr.msk.f32.mxu1 %vm387_vm3, %v374_v9  ;;  %v363_v13 = vld [vmem:[%s4493_s30 + $0x8] sm:$0xff]  ;;  %v364_v16 = vld [vmem:[%s4493_s30 + $0x10] sm:$0xff] }
  0xcc   :  { %3050 = vmatprep.subr.mxu0 %v372_v10  ;;  %3034 = vmatmul.mubr.msk.f32.vlgmr.msra.gmra.mxu1 %vm387_vm3, %v375_v11  ;;  %v377_v17 = vld [vmem:[%s4492_s20 + $0x18] sm:$0xff]  ;;  %v378_v19 = vld [vmem:[%s4492_s20 + $0x20] sm:$0xff]  ;;  %v379_v23 = vld [vmem:[%s4492_s20 + $0x28] sm:$0xff] }
  0xcd   :  { %3051 = vmatpush3.msra.mxu0 %v372_v10  ;;  %3052 = vmatprep.mubr.msk.f32.mxu0 %vm533_vm4, %v362_v12  ;;  %v365_v20 = vld [vmem:[%s4493_s30 + $0x18] sm:$0xff]  ;;  %v366_v21 = vld [vmem:[%s4493_s30 + $0x20] sm:$0xff]  ;;  %v380_v24 = vld [vmem:[%s4492_s20 + $0x30] sm:$0xff] }
  0xce   :  { %3053 = vmatmul.mubr.msk.f32.vlgmr.msra.gmra.mxu0 %vm533_vm4, %v363_v13  ;;  %3068 = vmatpush3.msra.mxu1 %v3982_v14  ;;  %v367_v26 = vld [vmem:[%s4493_s30 + $0x28] sm:$0xff]  ;;  %v368_v27 = vld [vmem:[%s4493_s30 + $0x30] sm:$0xff]  ;;  %v381_v28 = vld [vmem:[%s4492_s20 + $0x38] sm:$0xff] }
  0xcf   :  { %3036 = vmatprep.mubr.msk.f32.mxu1 %vm387_vm3, %v376_v15  ;;  %3055 = vmatprep.mubr.msk.f32.mxu0 %vm533_vm4, %v364_v16  ;;  %v382_v29 = vld [vmem:[%s4492_s20 + $0x40] sm:$0xff]  ;;  %v369_v30 = vld [vmem:[%s4493_s30 + $0x38] sm:$0xff]  ;;  %v383_v32 = vld [vmem:[%s4492_s20 + $0x48] sm:$0xff]  ;;  %s3751_s20 = smov 64  }
  0xd0   :  { %3037 = vmatmul.mubr.msk.f32.gmra.mxu1 %vm387_vm3, %v377_v17  ;;  %3069 = vmatprep.subr.mxu1 %v3749_v1  ;;  %v370_v31 = vld [vmem:[%s4493_s30 + $0x40] sm:$0xff]  ;;  %v371_v33 = vld [vmem:[%s4493_s30 + $0x48] sm:$0xff]  ;;  %s3752_s30 = smov 32  }
  0xd1   :  { %3070 = vmatpush3.msra.mxu1 %v3998_v18  ;;  %3039 = vmatprep.mubr.msk.f32.mxu1 %vm387_vm3, %v378_v19 }
  0xd2   :  { %3056 = vmatmul.mubr.msk.f32.gmra.mxu0 %vm533_vm4, %v365_v20  ;;  %3071 = vmatprep.subr.mxu1 %v3749_v1 }
  0xd3   :  { %3058 = vmatprep.mubr.msk.f32.mxu0 %vm533_vm4, %v366_v21  ;;  %3072 = vmatpush3.msra.mxu1 %v4013_v22 }
  0xd4   :  { %3040 = vmatmul.mubr.msk.f32.gmra.mxu1 %vm387_vm3, %v379_v23  ;;  %3073 = vmatprep.subr.mxu1 %v3749_v1 }
  0xd5   :  { %3042 = vmatprep.mubr.msk.f32.mxu1 %vm387_vm3, %v380_v24  ;;  %3074 = vmatpush3.msra.mxu1 %v4025_v25 }
  0xd6   :  { %3059 = vmatmul.mubr.msk.f32.gmra.mxu0 %vm533_vm4, %v367_v26  ;;  %3078 = vmatprep.subr.mxu0 %v3749_v1 }
  0xd7   :  { %3061 = vmatprep.mubr.msk.f32.mxu0 %vm533_vm4, %v368_v27  ;;  %3079 = vmatpush3.msra.mxu0 %v3982_v14 }
  0xd8   :  { %3043 = vmatmul.mubr.msk.f32.gmra.mxu1 %vm387_vm3, %v381_v28  ;;  %3080 = vmatprep.subr.mxu0 %v3749_v1  ;;  %v704_v28 = vld [vmem:[%s4494_s9] sm:$0xff] }
  0xd9   :  { %3045 = vmatprep.mubr.msk.f32.mxu1 %vm387_vm3, %v382_v29  ;;  %3081 = vmatpush3.msra.mxu0 %v3998_v18  ;;  %v3753_v29 = vmov 0  }
  0xda   :  { %3062 = vmatmul.mubr.msk.f32.gmra.mxu0 %vm533_vm4, %v369_v30  ;;  %3082 = vmatprep.subr.mxu0 %v3749_v1 }
  0xdb   :  { %3064 = vmatprep.mubr.msk.f32.mxu0 %vm533_vm4, %v370_v31  ;;  %3083 = vmatpush3.msra.mxu0 %v4013_v22 }
  0xdc   :  { %3046 = vmatmul.mubr.msk.f32.gmra.mxu1 %vm387_vm3, %v383_v32  ;;  %3084 = vmatprep.subr.mxu0 %v3749_v1  ;;  %vm2810_vm3 = vcmask 793600  }
  0xdd   :  { %3075 = vmatprep.mubr.msk.f32.mxu1 %vm3750_vm0, %v3749_v1  ;;  %3085 = vmatpush3.msra.mxu0 %v4025_v25 }
  0xde   :  { %3065 = vmatmul.mubr.msk.f32.gmra.mxu0 %vm533_vm4, %v371_v33  ;;  %3089 = vmatprep.subr.mxu1 %v3749_v1 }
  0xdf   :  { %3086 = vmatprep.mubr.msk.f32.mxu0 %vm3750_vm0, %v3749_v1  ;;  %3100 = vmatprep.subr.mxu0 %v3749_v1 }
  0xe0   :  { %3076 = vmatmul.mubr.f32.vlgmr.msra.gmra.mxu1 %v3749_v1  ;;  %3303 = vset.pattern.permute.xlu0 %v3753_v29 }
  0xe1   :  { %3090 = vmatpush3.msra.mxu1 %v3982_v14  ;;  %3097 = vmatprep.mubr.msk.f32.mxu1 %vm3750_vm0, %v3749_v1 }
  0xe2   :  { %3091 = vmatprep.subr.mxu1 %v3749_v1  ;;  %3302 = vset.pattern.permute.xlu1 %v3753_v29 }
  0xe3   :  { %3092 = vmatpush3.msra.mxu1 %v3998_v18 }
  0xe4   :  { %3093 = vmatprep.subr.mxu1 %v3749_v1 }
  0xe5   :  { %3094 = vmatpush3.msra.mxu1 %v4013_v22 }
  0xe6   :  { %3095 = vmatprep.subr.mxu1 %v3749_v1 }
  0xe7   :  { %3096 = vmatpush3.msra.mxu1 %v4025_v25 }
  0xe8   :  { %3111 = vmatprep.subr.mxu1 %v3749_v1 }
 0x18a   :  { %v4090_v34 = vpop.f32.mrf.mxu0 }
 0x18c   :  { %v3026_v35 = vpop.f32.mrf.mxu0  ;;  %v3035_v36 = vpop.f32.mrf.mxu1 }
 0x18d   :  { %v700_v35 = vld [vmem:[%s4495_s5] sm:$0xff] }
 0x18e   :  { %v3054_v37 = vpop.f32.mrf.mxu0  ;;  %v484_v38 = vpop.f32.mrf.mxu1 }
 0x18f   :  { %v636_v40 = vadd.f32 %v3054_v37, %v3035_v36 }
 0x190   :  { %v630_v41 = vpop.f32.mrf.mxu0  ;;  %v3038_v42 = vpop.f32.mrf.mxu1 }
 0x191   :  { %v4092_v43 = vadd.f32 %v2856_v39, %v636_v40  ;;  %v631_v61 = vadd.f32 %v630_v41, %v484_v38 }
 0x192   :  { %v3057_v44 = vpop.f32.mrf.mxu0  ;;  %v494_v45 = vpop.f32.mrf.mxu1 }
 0x193   :  { %v646_v46 = vadd.f32 %v3057_v44, %v3038_v42  ;;  %v686_v8 = vadd.f32 %v2856_v39, %v631_v61 }
 0x194   :  { %v640_v47 = vpop.f32.mrf.mxu0  ;;  %v3041_v48 = vpop.f32.mrf.mxu1 }
 0x195   :  { %v641_v49 = vadd.f32 %v640_v47, %v494_v45  ;;  %v4094_v50 = vadd.f32 %v2856_v39, %v646_v46 }
 0x196   :  { %v3060_v51 = vpop.f32.mrf.mxu0  ;;  %v504_v52 = vpop.f32.mrf.mxu1 }
 0x197   :  { %v656_v53 = vadd.f32 %v3060_v51, %v3041_v48  ;;  %v4096_v54 = vadd.f32 %v2856_v39, %v641_v49 }
 0x198   :  { %v650_v55 = vpop.f32.mrf.mxu0  ;;  %v3044_v56 = vpop.f32.mrf.mxu1 }
 0x199   :  { %v651_v57 = vadd.f32 %v650_v55, %v504_v52  ;;  %v4098_v58 = vadd.f32 %v2856_v39, %v656_v53 }
 0x19a   :  { %v3063_v59 = vpop.f32.mrf.mxu0  ;;  %v514_v60 = vpop.f32.mrf.mxu1 }
 0x19b   :  { %v666_v62 = vadd.f32 %v3063_v59, %v3044_v56  ;;  %v4100_v63 = vadd.f32 %v2856_v39, %v651_v57 }
 0x19c   :  { %v660_v0 = vpop.f32.mrf.mxu0  ;;  %v3047_v2 = vpop.f32.mrf.mxu1 }
 0x19d   :  { %v661_v3 = vadd.f32 %v660_v0, %v514_v60  ;;  %v4102_v4 = vadd.f32 %v2856_v39, %v666_v62 }
 0x19e   :  { %v3066_v5 = vpop.f32.mrf.mxu0  ;;  %v524_v6 = vpop.f32.mrf.mxu1 }
 0x19f   :  { %v676_v7 = vadd.f32 %v3066_v5, %v3047_v2  ;;  %v4104_v9 = vadd.f32 %v2856_v39, %v661_v3 }
 0x1a0   :  { %v670_v10 = vpop.f32.mrf.mxu0  ;;  %v779_v11 = vpop.f32.mrf.mxu1 }
 0x1a1   :  { %v671_v12 = vadd.f32 %v670_v10, %v524_v6  ;;  %v783_v13 = vadd.f32 %v779_v11, %v686_v8  ;;  %v4106_v15 = vadd.f32 %v2856_v39, %v676_v7 }
 0x1a2   :  { %v3077_v16 = vpop.f32.mrf.mxu1 }
 0x1a3   :  { %3304 = vtanh.f32 %v783_v13  ;;  %v4108_v17 = vadd.f32 %v2856_v39, %v671_v12  ;;  %v2857_v20 = vmul.f32 -1.442695, %v783_v13 }
 0x1a5   :  { %3306 = vpow2.f32 %v2857_v20 }
 0x1b0   :  { %v3305_v19 = vpop.eup %3304 }
 0x1b1   :  { %793 = vrot.lane.b32.xlu0 %v3305_v19, %s3751_s20 }
 0x1b2   :  { %v3307_v21 = vpop.eup %3306 }
 0x1b3   :  { %v787_v23 = vadd.f32 1.0, %v3307_v21 }
 0x1b5   :  { %3308 = vrcp.f32 %v787_v23 }
 0x1c2   :  { %v3309_v24 = vpop.eup %3308 }
 0x1c3   :  { %v791_v30 = vmul.f32 0.0, %v3309_v24 }
 0x223   :  { %v794_v26 = vpop.permute.xlu0 %793 }
 0x224   :  { %v796_v27 = vmul.f32 %v3309_v24, %v794_v26 }
 0x226   :  { %798 = vrot.lane.b32.xlu0 %v796_v27, %s3752_s30 }
 0x22a   :  { %706 = vperm.xlu0 %3303, %v704_v28  }
 0x298   :  { %v799_v31 = vpop.permute.xlu0 %798 }
 0x299   :  { %v801_v32 = vadd.f32 %v799_v31, %v791_v30 }
 0x29b   :  { %3310 = vtanh.f32 %v801_v32 }
 0x2a5   :  { %v707_v38 = vpop.permute.xlu0 %706 }
 0x2a8   :  { %v3311_v33 = vpop.eup %3310 }
 0x2a9   :  { %804 = vrot.lane.b32.xlu1 %v3311_v33, %s3751_s20 }
 0x2ad   :  { %702 = vperm.xlu1 %3302, %v700_v35  }
 0x31b   :  { %v805_v36 = vpop.permute.xlu1 %804 }
 0x31c   :  { %v807_v37 = vmul.f32 %v3309_v24, %v805_v36 }
 0x31e   :  { %810 = vrot.lane.b32.xlu1 %v807_v37, %s3752_s30 }
 0x322   :  { %815 = vrot.lane.b32.xlu1 %v801_v32, %s3754_s0 }
 0x328   :  { %v703_v39 = vpop.permute.xlu1 %702 }
 0x329   :  { %v4122_v40 = vsel %vm533_vm4, %v703_v39, %v707_v38 }
 0x32a   :  { %vm808_vm5 = vcmp.gt.s32.totalorder %v4122_v40, 0  ;;  %vm921_vm7 = vcmp.gt.s32.totalorder %v4122_v40, 1  ;;  %vm1034_vm8 = vcmp.gt.s32.totalorder %v4122_v40, 2  ;;  %vm1147_vm9 = vcmp.gt.s32.totalorder %v4122_v40, 3 }
 0x32b   :  { %vm1260_vm10 = vcmp.gt.s32.totalorder %v4122_v40, 4  ;;  %vm1373_vm11 = vcmp.gt.s32.totalorder %v4122_v40, 5  ;;  %vm1486_vm12 = vcmp.gt.s32.totalorder %v4122_v40, 6  ;;  %vm1599_vm13 = vcmp.gt.s32.totalorder %v4122_v40, 7 }
 0x32c   :  { %vm1712_vm14 = vcmp.gt.s32.totalorder %v4122_v40, 8  ;;  %vm1825_vm15 = vcmp.gt.s32.totalorder %v4122_v40, 9  ;;  %v2003_v40 = vld [vmem:[#allocation16 + $0x18] sm:$0xff] }
 0x390   :  { %v811_v41 = vpop.permute.xlu1 %810 }
 0x391   :  { %v813_v42 = vsel %vm808_vm5, %v811_v41, 0.0 }
 0x392   :  { %3087 = vmatmul.mubr.msk.f32.vlgmr.msra.gmra.mxu0 %vm709_vm6, %v813_v42 }
 0x393   :  { %3101 = vmatpush3.msra.mxu0 %v3982_v14  ;;  %3108 = vmatprep.mubr.msk.f32.mxu0 %vm3750_vm0, %v3749_v1 }
 0x394   :  { %v816_v44 = vpop.permute.xlu1 %815  ;;  %3102 = vmatprep.subr.mxu0 %v3749_v1 }
 0x395   :  { %v818_v45 = vsel %vm808_vm5, %v816_v44, 0.0  ;;  %3103 = vmatpush3.msra.mxu0 %v3998_v18  ;;  %vm2814_vm5 = vcmask 809984  }
 0x396   :  { %901 = vrot.lane.b32.xlu1 %v818_v45, %s3752_s30  ;;  %3104 = vmatprep.subr.mxu0 %v3749_v1 }
 0x397   :  { %3105 = vmatpush3.msra.mxu0 %v4013_v22 }
 0x398   :  { %3106 = vmatprep.subr.mxu0 %v3749_v1 }
 0x399   :  { %3107 = vmatpush3.msra.mxu0 %v4025_v25 }
 0x39a   :  { %3122 = vmatprep.subr.mxu0 %v3749_v1 }
 0x408   :  { %v902_v59 = vpop.permute.xlu1 %901 }
 0x452   :  { %v888_v46 = vpop.f32.mrf.mxu0 }
 0x453   :  { %v892_v47 = vadd.f32 %v888_v46, %v4092_v43 }
 0x454   :  { %v3088_v48 = vpop.f32.mrf.mxu0 }
 0x455   :  { %3312 = vtanh.f32 %v892_v47  ;;  %v2859_v51 = vmul.f32 -1.442695, %v892_v47 }
 0x457   :  { %3314 = vpow2.f32 %v2859_v51 }
 0x462   :  { %v3313_v49 = vpop.eup %3312 }
 0x463   :  { %906 = vrot.lane.b32.xlu0 %v3313_v49, %s3751_s20 }
 0x464   :  { %v3315_v52 = vpop.eup %3314 }
 0x465   :  { %v896_v53 = vadd.f32 1.0, %v3315_v52 }
 0x467   :  { %3316 = vrcp.f32 %v896_v53 }
 0x474   :  { %v3317_v55 = vpop.eup %3316 }
 0x475   :  { %v904_v60 = vmul.f32 %v3317_v55, %v902_v59 }
 0x4d5   :  { %v907_v56 = vpop.permute.xlu0 %906 }
 0x4d6   :  { %v909_v57 = vmul.f32 %v3317_v55, %v907_v56 }
 0x4d8   :  { %911 = vrot.lane.b32.xlu0 %v909_v57, %s3752_s30 }
 0x54a   :  { %v912_v61 = vpop.permute.xlu0 %911 }
 0x54b   :  { %v914_v62 = vadd.f32 %v912_v61, %v904_v60 }
 0x54d   :  { %3318 = vtanh.f32 %v914_v62 }
 0x55a   :  { %v3319_v43 = vpop.eup %3318 }
 0x55b   :  { %917 = vrot.lane.b32.xlu1 %v3319_v43, %s3751_s20 }
 0x55f   :  { %928 = vrot.lane.b32.xlu1 %v914_v62, %s3754_s0 }
 0x5cd   :  { %v918_v0 = vpop.permute.xlu1 %917 }
 0x5ce   :  { %v920_v2 = vmul.f32 %v3317_v55, %v918_v0 }
 0x5d0   :  { %923 = vrot.lane.b32.xlu0 %v920_v2, %s3752_s30 }
 0x5d1   :  { %v929_v3 = vpop.permute.xlu1 %928 }
 0x5d2   :  { %v931_v5 = vsel %vm921_vm7, %v929_v3, %v818_v45 }
 0x5d3   :  { %1014 = vrot.lane.b32.xlu1 %v931_v5, %s3752_s30 }
 0x642   :  { %v924_v6 = vpop.permute.xlu0 %923 }
 0x643   :  { %v926_v7 = vsel %vm921_vm7, %v924_v6, %v813_v42  ;;  %vm2818_vm7 = vcmask 826368  }
 0x644   :  { %3098 = vmatmul.mubr.msk.f32.vlgmr.msra.gmra.mxu1 %vm709_vm6, %v926_v7 }
 0x645   :  { %3112 = vmatpush3.msra.mxu1 %v3982_v14  ;;  %3119 = vmatprep.mubr.msk.f32.mxu1 %vm3750_vm0, %v3749_v1  ;;  %v1015_v24 = vpop.permute.xlu1 %1014 }
 0x646   :  { %3113 = vmatprep.subr.mxu1 %v3749_v1 }
 0x647   :  { %3114 = vmatpush3.msra.mxu1 %v3998_v18 }
 0x648   :  { %3115 = vmatprep.subr.mxu1 %v3749_v1 }
 0x649   :  { %3116 = vmatpush3.msra.mxu1 %v4013_v22 }
 0x64a   :  { %3117 = vmatprep.subr.mxu1 %v3749_v1 }
 0x64b   :  { %3118 = vmatpush3.msra.mxu1 %v4025_v25 }
 0x64c   :  { %3133 = vmatprep.subr.mxu1 %v3749_v1 }
 0x704   :  { %v1001_v8 = vpop.f32.mrf.mxu1 }
 0x705   :  { %v1005_v10 = vadd.f32 %v1001_v8, %v4096_v54 }
 0x706   :  { %v3099_v11 = vpop.f32.mrf.mxu1 }
 0x707   :  { %3320 = vtanh.f32 %v1005_v10  ;;  %v2861_v13 = vmul.f32 -1.442695, %v1005_v10 }
 0x709   :  { %3322 = vpow2.f32 %v2861_v13 }
 0x714   :  { %v3321_v12 = vpop.eup %3320 }
 0x715   :  { %1019 = vrot.lane.b32.xlu0 %v3321_v12, %s3751_s20 }
 0x716   :  { %v3323_v16 = vpop.eup %3322 }
 0x717   :  { %v1009_v19 = vadd.f32 1.0, %v3323_v16 }
 0x719   :  { %3324 = vrcp.f32 %v1009_v19 }
 0x726   :  { %v3325_v20 = vpop.eup %3324 }
 0x727   :  { %v1017_v26 = vmul.f32 %v3325_v20, %v1015_v24 }
 0x787   :  { %v1020_v21 = vpop.permute.xlu0 %1019 }
 0x788   :  { %v1022_v23 = vmul.f32 %v3325_v20, %v1020_v21 }
 0x78a   :  { %1024 = vrot.lane.b32.xlu0 %v1022_v23, %s3752_s30 }
 0x7fc   :  { %v1025_v27 = vpop.permute.xlu0 %1024 }
 0x7fd   :  { %v1027_v28 = vadd.f32 %v1025_v27, %v1017_v26 }
 0x7ff   :  { %3326 = vtanh.f32 %v1027_v28 }
 0x80c   :  { %v3327_v54 = vpop.eup %3326 }
 0x80d   :  { %1030 = vrot.lane.b32.xlu1 %v3327_v54, %s3751_s20 }
 0x811   :  { %1041 = vrot.lane.b32.xlu1 %v1027_v28, %s3754_s0 }
 0x87f   :  { %v1031_v29 = vpop.permute.xlu1 %1030 }
 0x880   :  { %v1033_v30 = vmul.f32 %v3325_v20, %v1031_v29 }
 0x882   :  { %1036 = vrot.lane.b32.xlu0 %v1033_v30, %s3752_s30 }
 0x883   :  { %v1042_v31 = vpop.permute.xlu1 %1041 }
 0x884   :  { %v1044_v32 = vsel %vm1034_vm8, %v1042_v31, %v931_v5 }
 0x885   :  { %1127 = vrot.lane.b32.xlu1 %v1044_v32, %s3752_s30 }
 0x8f4   :  { %v1037_v33 = vpop.permute.xlu0 %1036 }
 0x8f5   :  { %v1039_v35 = vsel %vm1034_vm8, %v1037_v33, %v926_v7 }
 0x8f6   :  { %3109 = vmatmul.mubr.msk.f32.vlgmr.msra.gmra.mxu0 %vm709_vm6, %v1039_v35 }
 0x8f7   :  { %3123 = vmatpush3.msra.mxu0 %v3982_v14  ;;  %3130 = vmatprep.mubr.msk.f32.mxu0 %vm3750_vm0, %v3749_v1  ;;  %v1128_v48 = vpop.permute.xlu1 %1127 }
 0x8f8   :  { %3124 = vmatprep.subr.mxu0 %v3749_v1 }
 0x8f9   :  { %3125 = vmatpush3.msra.mxu0 %v3998_v18 }
 0x8fa   :  { %3126 = vmatprep.subr.mxu0 %v3749_v1 }
 0x8fb   :  { %3127 = vmatpush3.msra.mxu0 %v4013_v22 }
 0x8fc   :  { %3128 = vmatprep.subr.mxu0 %v3749_v1 }
 0x8fd   :  { %3129 = vmatpush3.msra.mxu0 %v4025_v25 }
 0x8fe   :  { %3144 = vmatprep.subr.mxu0 %v3749_v1 }
 0x9b6   :  { %v1114_v36 = vpop.f32.mrf.mxu0 }
 0x9b7   :  { %v1118_v37 = vadd.f32 %v1114_v36, %v4094_v50 }
 0x9b8   :  { %v3110_v38 = vpop.f32.mrf.mxu0 }
 0x9b9   :  { %3328 = vtanh.f32 %v1118_v37  ;;  %v2863_v41 = vmul.f32 -1.442695, %v1118_v37 }
 0x9bb   :  { %3330 = vpow2.f32 %v2863_v41 }
 0x9c6   :  { %v3329_v39 = vpop.eup %3328 }
 0x9c7   :  { %1132 = vrot.lane.b32.xlu0 %v3329_v39, %s3751_s20 }
 0x9c8   :  { %v3331_v42 = vpop.eup %3330 }
 0x9c9   :  { %v1122_v44 = vadd.f32 1.0, %v3331_v42 }
 0x9cb   :  { %3332 = vrcp.f32 %v1122_v44 }
 0x9d8   :  { %v3333_v45 = vpop.eup %3332 }
 0x9d9   :  { %v1130_v49 = vmul.f32 %v3333_v45, %v1128_v48 }
 0xa39   :  { %v1133_v46 = vpop.permute.xlu0 %1132 }
 0xa3a   :  { %v1135_v47 = vmul.f32 %v3333_v45, %v1133_v46 }
 0xa3c   :  { %1137 = vrot.lane.b32.xlu0 %v1135_v47, %s3752_s30 }
 0xaae   :  { %v1138_v51 = vpop.permute.xlu0 %1137 }
 0xaaf   :  { %v1140_v52 = vadd.f32 %v1138_v51, %v1130_v49 }
 0xab1   :  { %3334 = vtanh.f32 %v1140_v52 }
 0xabe   :  { %v3335_v50 = vpop.eup %3334 }
 0xabf   :  { %1143 = vrot.lane.b32.xlu1 %v3335_v50, %s3751_s20 }
 0xac3   :  { %1154 = vrot.lane.b32.xlu1 %v1140_v52, %s3754_s0 }
 0xb31   :  { %v1144_v53 = vpop.permute.xlu1 %1143 }
 0xb32   :  { %v1146_v55 = vmul.f32 %v3333_v45, %v1144_v53 }
 0xb34   :  { %1149 = vrot.lane.b32.xlu0 %v1146_v55, %s3752_s30 }
 0xb35   :  { %v1155_v56 = vpop.permute.xlu1 %1154 }
 0xb36   :  { %v1157_v57 = vsel %vm1147_vm9, %v1155_v56, %v1044_v32 }
 0xb37   :  { %1240 = vrot.lane.b32.xlu1 %v1157_v57, %s3752_s30 }
 0xba6   :  { %v1150_v59 = vpop.permute.xlu0 %1149 }
 0xba7   :  { %v1152_v60 = vsel %vm1147_vm9, %v1150_v59, %v1039_v35 }
 0xba8   :  { %3120 = vmatmul.mubr.msk.f32.vlgmr.msra.gmra.mxu1 %vm709_vm6, %v1152_v60 }
 0xba9   :  { %3134 = vmatpush3.msra.mxu1 %v3982_v14  ;;  %3141 = vmatprep.mubr.msk.f32.mxu1 %vm3750_vm0, %v3749_v1  ;;  %v1241_v10 = vpop.permute.xlu1 %1240 }
 0xbaa   :  { %3135 = vmatprep.subr.mxu1 %v3749_v1 }
 0xbab   :  { %3136 = vmatpush3.msra.mxu1 %v3998_v18 }
 0xbac   :  { %3137 = vmatprep.subr.mxu1 %v3749_v1 }
 0xbad   :  { %3138 = vmatpush3.msra.mxu1 %v4013_v22 }
 0xbae   :  { %3139 = vmatprep.subr.mxu1 %v3749_v1 }
 0xbaf   :  { %3140 = vmatpush3.msra.mxu1 %v4025_v25 }
 0xbb0   :  { %3155 = vmatprep.subr.mxu1 %v3749_v1 }
 0xc68   :  { %v1227_v61 = vpop.f32.mrf.mxu1 }
 0xc69   :  { %v1231_v62 = vadd.f32 %v1227_v61, %v4100_v63 }
 0xc6a   :  { %v3121_v43 = vpop.f32.mrf.mxu1 }
 0xc6b   :  { %3336 = vtanh.f32 %v1231_v62  ;;  %v2865_v2 = vmul.f32 -1.442695, %v1231_v62 }
 0xc6d   :  { %3338 = vpow2.f32 %v2865_v2 }
 0xc78   :  { %v3337_v0 = vpop.eup %3336 }
 0xc79   :  { %1245 = vrot.lane.b32.xlu0 %v3337_v0, %s3751_s20 }
 0xc7a   :  { %v3339_v3 = vpop.eup %3338 }
 0xc7b   :  { %v1235_v5 = vadd.f32 1.0, %v3339_v3 }
 0xc7d   :  { %3340 = vrcp.f32 %v1235_v5 }
 0xc8a   :  { %v3341_v6 = vpop.eup %3340 }
 0xc8b   :  { %v1243_v11 = vmul.f32 %v3341_v6, %v1241_v10 }
 0xceb   :  { %v1246_v7 = vpop.permute.xlu0 %1245 }
 0xcec   :  { %v1248_v8 = vmul.f32 %v3341_v6, %v1246_v7 }
 0xcee   :  { %1250 = vrot.lane.b32.xlu0 %v1248_v8, %s3752_s30 }
 0xd60   :  { %v1251_v12 = vpop.permute.xlu0 %1250 }
 0xd61   :  { %v1253_v13 = vadd.f32 %v1251_v12, %v1243_v11 }
 0xd63   :  { %3342 = vtanh.f32 %v1253_v13 }
 0xd70   :  { %v3343_v63 = vpop.eup %3342 }
 0xd71   :  { %1256 = vrot.lane.b32.xlu1 %v3343_v63, %s3751_s20 }
 0xd75   :  { %1267 = vrot.lane.b32.xlu1 %v1253_v13, %s3754_s0 }
 0xde3   :  { %v1257_v16 = vpop.permute.xlu1 %1256 }
 0xde4   :  { %v1259_v19 = vmul.f32 %v3341_v6, %v1257_v16 }
 0xde6   :  { %1262 = vrot.lane.b32.xlu0 %v1259_v19, %s3752_s30 }
 0xde7   :  { %v1268_v20 = vpop.permute.xlu1 %1267 }
 0xde8   :  { %v1270_v21 = vsel %vm1260_vm10, %v1268_v20, %v1157_v57 }
 0xde9   :  { %1353 = vrot.lane.b32.xlu1 %v1270_v21, %s3752_s30 }
 0xe58   :  { %v1263_v23 = vpop.permute.xlu0 %1262 }
 0xe59   :  { %v1265_v24 = vsel %vm1260_vm10, %v1263_v23, %v1152_v60 }
 0xe5a   :  { %3131 = vmatmul.mubr.msk.f32.vlgmr.msra.gmra.mxu0 %vm709_vm6, %v1265_v24 }
 0xe5b   :  { %3145 = vmatpush3.msra.mxu0 %v3982_v14  ;;  %3152 = vmatprep.mubr.msk.f32.mxu0 %vm3750_vm0, %v3749_v1  ;;  %v1354_v36 = vpop.permute.xlu1 %1353 }
 0xe5c   :  { %3146 = vmatprep.subr.mxu0 %v3749_v1 }
 0xe5d   :  { %3147 = vmatpush3.msra.mxu0 %v3998_v18 }
 0xe5e   :  { %3148 = vmatprep.subr.mxu0 %v3749_v1 }
 0xe5f   :  { %3149 = vmatpush3.msra.mxu0 %v4013_v22 }
 0xe60   :  { %3150 = vmatprep.subr.mxu0 %v3749_v1 }
 0xe61   :  { %3151 = vmatpush3.msra.mxu0 %v4025_v25 }
 0xe62   :  { %3166 = vmatprep.subr.mxu0 %v3749_v1 }
 0xf1a   :  { %v1340_v26 = vpop.f32.mrf.mxu0 }
 0xf1b   :  { %v1344_v27 = vadd.f32 %v1340_v26, %v4098_v58 }
 0xf1c   :  { %v3132_v28 = vpop.f32.mrf.mxu0 }
 0xf1d   :  { %3344 = vtanh.f32 %v1344_v27  ;;  %v2867_v29 = vmul.f32 -1.442695, %v1344_v27 }
 0xf1f   :  { %3346 = vpow2.f32 %v2867_v29 }
 0xf2a   :  { %v3345_v54 = vpop.eup %3344 }
 0xf2b   :  { %1358 = vrot.lane.b32.xlu0 %v3345_v54, %s3751_s20 }
 0xf2c   :  { %v3347_v30 = vpop.eup %3346 }
 0xf2d   :  { %v1348_v31 = vadd.f32 1.0, %v3347_v30 }
 0xf2f   :  { %3348 = vrcp.f32 %v1348_v31 }
 0xf3c   :  { %v3349_v32 = vpop.eup %3348 }
 0xf3d   :  { %v1356_v37 = vmul.f32 %v3349_v32, %v1354_v36 }
 0xf9d   :  { %v1359_v33 = vpop.permute.xlu0 %1358 }
 0xf9e   :  { %v1361_v35 = vmul.f32 %v3349_v32, %v1359_v33 }
 0xfa0   :  { %1363 = vrot.lane.b32.xlu0 %v1361_v35, %s3752_s30 }
0x1012   :  { %v1364_v38 = vpop.permute.xlu0 %1363 }
0x1013   :  { %v1366_v39 = vadd.f32 %v1364_v38, %v1356_v37 }
0x1015   :  { %3350 = vtanh.f32 %v1366_v39 }
0x1022   :  { %v3351_v58 = vpop.eup %3350 }
0x1023   :  { %1369 = vrot.lane.b32.xlu1 %v3351_v58, %s3751_s20 }
0x1027   :  { %1380 = vrot.lane.b32.xlu1 %v1366_v39, %s3754_s0 }
0x1095   :  { %v1370_v41 = vpop.permute.xlu1 %1369 }
0x1096   :  { %v1372_v42 = vmul.f32 %v3349_v32, %v1370_v41 }
0x1098   :  { %1375 = vrot.lane.b32.xlu0 %v1372_v42, %s3752_s30 }
0x1099   :  { %v1381_v44 = vpop.permute.xlu1 %1380 }
0x109a   :  { %v1383_v45 = vsel %vm1373_vm11, %v1381_v44, %v1270_v21 }
0x109b   :  { %1466 = vrot.lane.b32.xlu1 %v1383_v45, %s3752_s30 }
0x110a   :  { %v1376_v46 = vpop.permute.xlu0 %1375 }
0x110b   :  { %v1378_v47 = vsel %vm1373_vm11, %v1376_v46, %v1265_v24 }
0x110c   :  { %3142 = vmatmul.mubr.msk.f32.vlgmr.msra.gmra.mxu1 %vm709_vm6, %v1378_v47 }
0x110d   :  { %3156 = vmatpush3.msra.mxu1 %v3982_v14  ;;  %3163 = vmatprep.mubr.msk.f32.mxu1 %vm3750_vm0, %v3749_v1  ;;  %v1467_v60 = vpop.permute.xlu1 %1466 }
0x110e   :  { %3157 = vmatprep.subr.mxu1 %v3749_v1 }
0x110f   :  { %3158 = vmatpush3.msra.mxu1 %v3998_v18 }
0x1110   :  { %3159 = vmatprep.subr.mxu1 %v3749_v1 }
0x1111   :  { %3160 = vmatpush3.msra.mxu1 %v4013_v22 }
0x1112   :  { %3161 = vmatprep.subr.mxu1 %v3749_v1 }
0x1113   :  { %3162 = vmatpush3.msra.mxu1 %v4025_v25 }
0x1114   :  { %3177 = vmatprep.subr.mxu1 %v3749_v1 }
0x11cc   :  { %v1453_v48 = vpop.f32.mrf.mxu1 }
0x11cd   :  { %v1457_v49 = vadd.f32 %v1453_v48, %v4104_v9 }
0x11ce   :  { %v3143_v51 = vpop.f32.mrf.mxu1 }
0x11cf   :  { %3352 = vtanh.f32 %v1457_v49  ;;  %v2869_v50 = vmul.f32 -1.442695, %v1457_v49  ;;  %v2833_v49 = vld [vmem:[%s4496_s24] ss:$0 sm:$0xff] }
0x11d0   :  { %v358_v51 = vadd.f32 %v2833_v49, %v4090_v34  ;;  %v1915_v34 = vld [vmem:[#allocation13] sm:$0xff] }
0x11d1   :  { %3354 = vpow2.f32 %v2869_v50  ;;  %v1918_v50 = vld [vmem:[#allocation13 + $0x18] sm:$0xff] }
0x11dc   :  { %v3353_v52 = vpop.eup %3352 }
0x11dd   :  { %1471 = vrot.lane.b32.xlu0 %v3353_v52, %s3751_s20 }
0x11de   :  { %v3355_v53 = vpop.eup %3354 }
0x11df   :  { %v1461_v55 = vadd.f32 1.0, %v3355_v53 }
0x11e1   :  { %3356 = vrcp.f32 %v1461_v55  ;;  %v1917_v55 = vld [vmem:[#allocation13 + $0x10] sm:$0xff] }
0x11ee   :  { %v3357_v56 = vpop.eup %3356 }
0x11ef   :  { %v1469_v61 = vmul.f32 %v3357_v56, %v1467_v60 }
0x124f   :  { %v1472_v57 = vpop.permute.xlu0 %1471 }
0x1250   :  { %v1474_v59 = vmul.f32 %v3357_v56, %v1472_v57 }
0x1252   :  { %1476 = vrot.lane.b32.xlu0 %v1474_v59, %s3752_s30 }
0x12c4   :  { %v1477_v62 = vpop.permute.xlu0 %1476 }
0x12c5   :  { %v1479_v43 = vadd.f32 %v1477_v62, %v1469_v61 }
0x12c7   :  { %3358 = vtanh.f32 %v1479_v43 }
0x12d4   :  { %v3359_v9 = vpop.eup %3358 }
0x12d5   :  { %1482 = vrot.lane.b32.xlu1 %v3359_v9, %s3751_s20 }
0x12d9   :  { %1493 = vrot.lane.b32.xlu1 %v1479_v43, %s3754_s0 }
0x1347   :  { %v1483_v0 = vpop.permute.xlu1 %1482 }
0x1348   :  { %v1485_v2 = vmul.f32 %v3357_v56, %v1483_v0  ;;  %v1916_v56 = vld [vmem:[#allocation13 + $0x8] sm:$0xff] }
0x134a   :  { %1488 = vrot.lane.b32.xlu0 %v1485_v2, %s3752_s30 }
0x134b   :  { %v1494_v3 = vpop.permute.xlu1 %1493 }
0x134c   :  { %v1496_v5 = vsel %vm1486_vm12, %v1494_v3, %v1383_v45 }
0x134d   :  { %1579 = vrot.lane.b32.xlu1 %v1496_v5, %s3752_s30 }
0x13bc   :  { %v1489_v6 = vpop.permute.xlu0 %1488 }
0x13bd   :  { %v1491_v7 = vsel %vm1486_vm12, %v1489_v6, %v1378_v47 }
0x13be   :  { %3153 = vmatmul.mubr.msk.f32.vlgmr.msra.gmra.mxu0 %vm709_vm6, %v1491_v7 }
0x13bf   :  { %3167 = vmatpush3.msra.mxu0 %v3982_v14  ;;  %3174 = vmatprep.mubr.msk.f32.mxu0 %vm3750_vm0, %v3749_v1 }
0x13c0   :  { %3168 = vmatprep.subr.mxu0 %v3749_v1 }
0x13c1   :  { %3169 = vmatpush3.msra.mxu0 %v3998_v18 }
0x13c2   :  { %3170 = vmatprep.subr.mxu0 %v3749_v1 }
0x13c3   :  { %3171 = vmatpush3.msra.mxu0 %v4013_v22 }
0x13c4   :  { %3172 = vmatprep.subr.mxu0 %v3749_v1 }
0x13c5   :  { %3173 = vmatpush3.msra.mxu0 %v4025_v25  ;;  %v1580_v25 = vpop.permute.xlu1 %1579 }
0x13c6   :  { %3188 = vmatprep.subr.mxu0 %v3749_v1 }
0x147e   :  { %v1566_v8 = vpop.f32.mrf.mxu0 }
0x147f   :  { %v1570_v14 = vadd.f32 %v1566_v8, %v4102_v4 }
0x1480   :  { %v3154_v10 = vpop.f32.mrf.mxu0 }
0x1481   :  { %3360 = vtanh.f32 %v1570_v14  ;;  %v2871_v12 = vmul.f32 -1.442695, %v1570_v14 }
0x1483   :  { %3362 = vpow2.f32 %v2871_v12  ;;  %v1833_v12 = vld [vmem:[#allocation11 + $0x10] sm:$0xff] }
0x148e   :  { %v3361_v11 = vpop.eup %3360 }
0x148f   :  { %1584 = vrot.lane.b32.xlu0 %v3361_v11, %s3751_s20  ;;  %v1834_v11 = vld [vmem:[#allocation11 + $0x18] sm:$0xff] }
0x1490   :  { %v3363_v18 = vpop.eup %3362 }
0x1491   :  { %v1574_v13 = vadd.f32 1.0, %v3363_v18  ;;  %v1832_v18 = vld [vmem:[#allocation11 + $0x8] sm:$0xff] }
0x1493   :  { %3364 = vrcp.f32 %v1574_v13  ;;  %v1831_v13 = vld [vmem:[#allocation11] sm:$0xff] }
0x14a0   :  { %v3365_v22 = vpop.eup %3364 }
0x14a1   :  { %v1582_v19 = vmul.f32 %v3365_v22, %v1580_v25  ;;  %v2111_v25 = vld [vmem:[%s4468_s19 + $0x38] sm:$0xff] }
0x1501   :  { %v1585_v63 = vpop.permute.xlu0 %1584 }
0x1502   :  { %v1587_v16 = vmul.f32 %v3365_v22, %v1585_v63 }
0x1504   :  { %1589 = vrot.lane.b32.xlu0 %v1587_v16, %s3752_s30 }
0x1576   :  { %v1590_v20 = vpop.permute.xlu0 %1589 }
0x1577   :  { %v1592_v21 = vadd.f32 %v1590_v20, %v1582_v19  ;;  %v2110_v19 = vld [vmem:[%s4468_s19 + $0x30] sm:$0xff]  ;;  %v2109_v20 = vld [vmem:[%s4468_s19 + $0x28] sm:$0xff] }
0x1579   :  { %3366 = vtanh.f32 %v1592_v21 }
0x1586   :  { %v3367_v4 = vpop.eup %3366 }
0x1587   :  { %1595 = vrot.lane.b32.xlu1 %v3367_v4, %s3751_s20  ;;  %v2007_v4 = vld [vmem:[#allocation16 + $0x38] sm:$0xff] }
0x158b   :  { %1606 = vrot.lane.b32.xlu1 %v1592_v21, %s3754_s0 }
0x15f9   :  { %v1596_v23 = vpop.permute.xlu1 %1595 }
0x15fa   :  { %v1598_v24 = vmul.f32 %v3365_v22, %v1596_v23 }
0x15fc   :  { %1601 = vrot.lane.b32.xlu0 %v1598_v24, %s3752_s30  ;;  %v2006_v24 = vld [vmem:[#allocation16 + $0x30] sm:$0xff] }
0x15fd   :  { %v1607_v26 = vpop.permute.xlu1 %1606 }
0x15fe   :  { %v1609_v27 = vsel %vm1599_vm13, %v1607_v26, %v1496_v5  ;;  %v2005_v26 = vld [vmem:[#allocation16 + $0x28] sm:$0xff] }
0x15ff   :  { %1692 = vrot.lane.b32.xlu1 %v1609_v27, %s3752_s30 }
0x166e   :  { %v1602_v28 = vpop.permute.xlu0 %1601 }
0x166f   :  { %v1604_v54 = vsel %vm1599_vm13, %v1602_v28, %v1491_v7  ;;  %v2878_v28 = vld [vmem:[#allocation14] ss:$0 sm:$0xff] }
0x1670   :  { %3164 = vmatmul.mubr.msk.f32.vlgmr.msra.gmra.mxu1 %vm709_vm6, %v1604_v54 }
0x1671   :  { %3185 = vmatprep.mubr.msk.f32.mxu1 %vm3750_vm0, %v3749_v1  ;;  %v1693_v58 = vpop.permute.xlu1 %1692  ;;  %3178 = vmatpush3.msra.mxu1 %v1834_v11 }
0x1672   :  { %3179 = vmatprep.subr.mxu1 %v3749_v1 }
0x1673   :  { %3180 = vmatpush3.msra.mxu1 %v1833_v12 }
0x1674   :  { %3181 = vmatprep.subr.mxu1 %v3749_v1 }
0x1675   :  { %3182 = vmatpush3.msra.mxu1 %v1832_v18 }
0x1676   :  { %3183 = vmatprep.subr.mxu1 %v3749_v1 }
0x1677   :  { %3184 = vmatpush3.msra.mxu1 %v1831_v13 }
0x1678   :  { %3199 = vmatprep.subr.mxu1 %v3749_v1 }
0x1730   :  { %v1679_v29 = vpop.f32.mrf.mxu1 }
0x1731   :  { %v1683_v30 = vadd.f32 %v1679_v29, %v4108_v17 }
0x1732   :  { %v3165_v31 = vpop.f32.mrf.mxu1 }
0x1733   :  { %3368 = vtanh.f32 %v1683_v30  ;;  %v2873_v33 = vmul.f32 -1.442695, %v1683_v30  ;;  %v2001_v30 = vld [vmem:[#allocation16 + $0x8] sm:$0xff]  ;;  %v2000_v31 = vld [vmem:[#allocation16] sm:$0xff] }
0x1735   :  { %3370 = vpow2.f32 %v2873_v33  ;;  %v2108_v33 = vld [vmem:[%s4468_s19 + $0x20] sm:$0xff] }
0x1740   :  { %v3369_v32 = vpop.eup %3368 }
0x1741   :  { %1697 = vrot.lane.b32.xlu0 %v3369_v32, %s3751_s20 }
0x1742   :  { %v3371_v35 = vpop.eup %3370 }
0x1743   :  { %v1687_v36 = vadd.f32 1.0, %v3371_v35  ;;  %v2876_v35 = vld [vmem:[%s4461_s12] ss:$0 sm:$0xff] }
0x1745   :  { %3372 = vrcp.f32 %v1687_v36 }
0x1752   :  { %v3373_v37 = vpop.eup %3372 }
0x1753   :  { %v1695_v41 = vmul.f32 %v3373_v37, %v1693_v58  ;;  %v2106_v58 = vld [vmem:[%s4468_s19 + $0x10] sm:$0xff] }
0x17b3   :  { %v1698_v38 = vpop.permute.xlu0 %1697 }
0x17b4   :  { %v1700_v39 = vmul.f32 %v3373_v37, %v1698_v38  ;;  %v2107_v38 = vld [vmem:[%s4468_s19 + $0x18] sm:$0xff] }
0x17b6   :  { %1702 = vrot.lane.b32.xlu0 %v1700_v39, %s3752_s30 }
0x1828   :  { %v1703_v42 = vpop.permute.xlu0 %1702 }
0x1829   :  { %v1705_v44 = vadd.f32 %v1703_v42, %v1695_v41  ;;  %v2105_v41 = vld [vmem:[%s4468_s19 + $0x8] sm:$0xff]  ;;  %v2104_v42 = vld [vmem:[%s4468_s19] sm:$0xff] }
0x182b   :  { %3374 = vtanh.f32 %v1705_v44 }
0x182c   :  { %3376 = vtanh.f32 %v358_v51 }
0x1838   :  { %v3375_v17 = vpop.eup %3374 }
0x1839   :  { %1708 = vrot.lane.b32.xlu1 %v3375_v17, %s3751_s20  ;;  %v4283_v57 = vpop.eup %3376 }
0x183a   :  { %v2459_v13 = vmul.f32 %v4283_v57, %v4283_v57 }
0x183d   :  { %1719 = vrot.lane.b32.xlu1 %v1705_v44, %s3754_s0 }
0x18ab   :  { %v1709_v45 = vpop.permute.xlu1 %1708 }
0x18ac   :  { %v1711_v46 = vmul.f32 %v3373_v37, %v1709_v45  ;;  %v2267_v45 = vld [vmem:[#allocation22 + $0x18] sm:$0xff] }
0x18ae   :  { %1714 = vrot.lane.b32.xlu0 %v1711_v46, %s3752_s30  ;;  %v2266_v46 = vld [vmem:[#allocation22 + $0x10] sm:$0xff] }
0x18af   :  { %v1720_v47 = vpop.permute.xlu1 %1719 }
0x18b0   :  { %v1722_v48 = vsel %vm1712_vm14, %v1720_v47, %v1609_v27  ;;  %v2004_v27 = vld [vmem:[#allocation16 + $0x20] sm:$0xff]  ;;  %v2265_v47 = vld [vmem:[#allocation22 + $0x8] sm:$0xff] }
0x18b1   :  { %1805 = vrot.lane.b32.xlu1 %v1722_v48, %s3752_s30  ;;  %v2264_v48 = vld [vmem:[#allocation22] sm:$0xff] }
0x1920   :  { %v1715_v52 = vpop.permute.xlu0 %1714 }
0x1921   :  { %v4274_v53 = vsel %vm1712_vm14, %v1715_v52, %v1604_v54  ;;  %v2002_v54 = vld [vmem:[#allocation16 + $0x10] sm:$0xff] }
0x1922   :  { %3175 = vmatmul.mubr.msk.f32.vlgmr.msra.gmra.mxu0 %vm709_vm6, %v4274_v53 }
0x1923   :  { %3189 = vmatpush3.msra.mxu0 %v1918_v50  ;;  %3196 = vmatprep.mubr.msk.f32.mxu0 %vm3750_vm0, %v3749_v1  ;;  %v1806_v8 = vpop.permute.xlu1 %1805  ;;  %v2884_v50 = vld [vmem:[#allocation20] ss:$0 sm:$0xff] }
0x1924   :  { %3190 = vmatprep.subr.mxu0 %v3749_v1 }
0x1925   :  { %3191 = vmatpush3.msra.mxu0 %v1917_v55 }
0x1926   :  { %3192 = vmatprep.subr.mxu0 %v3749_v1 }
0x1927   :  { %3193 = vmatpush3.msra.mxu0 %v1916_v56 }
0x1928   :  { %3194 = vmatprep.subr.mxu0 %v3749_v1 }
0x1929   :  { %3195 = vmatpush3.msra.mxu0 %v1915_v34 }
0x192a   :  { %3197 = vmatmul.mubr.msk.f32.vlgmr.msra.gmra.mxu0 %vm709_vm6, %v4283_v57  ;;  %3218 = vmatprep.subr.mxu0 %v3749_v1 }
0x192b   :  { %3226 = vmatprep.mubr.msk.f32.mxu0 %vm3750_vm0, %v3749_v1  ;;  %3219 = vmatpush3.msra.mxu0 %v2111_v25 }
0x192c   :  { %3220 = vmatprep.subr.mxu0 %v3749_v1 }
0x192d   :  { %3221 = vmatpush3.msra.mxu0 %v2110_v19 }
0x192e   :  { %3222 = vmatprep.subr.mxu0 %v3749_v1 }
0x192f   :  { %3223 = vmatpush3.msra.mxu0 %v2109_v20 }
0x1930   :  { %3224 = vmatprep.subr.mxu0 %v3749_v1 }
0x1931   :  { %3225 = vmatpush3.msra.mxu0 %v2108_v33 }
0x1932   :  { %3229 = vmatprep.subr.mxu0 %v3749_v1 }
0x19e2   :  { %v1792_v59 = vpop.f32.mrf.mxu0 }
0x19e3   :  { %v1796_v60 = vadd.f32 %v1792_v59, %v4106_v15  ;;  %v2371_v59 = vld [vmem:[#allocation19 + $0x18] sm:$0xff] }
0x19e4   :  { %v3176_v61 = vpop.f32.mrf.mxu0 }
0x19e5   :  { %3378 = vtanh.f32 %v1796_v60  ;;  %v2875_v0 = vmul.f32 -1.442695, %v1796_v60  ;;  %v2370_v60 = vld [vmem:[#allocation19 + $0x10] sm:$0xff]  ;;  %v2369_v61 = vld [vmem:[#allocation19 + $0x8] sm:$0xff] }
0x19e7   :  { %3380 = vpow2.f32 %v2875_v0 }
0x19ea   :  { %v4291_v62 = vpop.f32.mrf.mxu0 }
0x19eb   :  { %v1996_v29 = vadd.f32 %v2878_v28, %v4291_v62  ;;  %v2368_v62 = vld [vmem:[#allocation19] sm:$0xff] }
0x19ec   :  { %v3198_v43 = vpop.f32.mrf.mxu0 }
0x19ed   :  { %v1999_v32 = vmax.f32 %v1996_v29, 0.0  ;;  %v2885_v43 = vld [vmem:[#allocation23] ss:$0 sm:$0xff] }
0x19f2   :  { %v3379_v9 = vpop.eup %3378 }
0x19f3   :  { %1810 = vrot.lane.b32.xlu0 %v3379_v9, %s3751_s20 }
0x19f4   :  { %v3381_v2 = vpop.eup %3380 }
0x19f5   :  { %v1800_v3 = vadd.f32 1.0, %v3381_v2 }
0x19f7   :  { %3382 = vrcp.f32 %v1800_v3 }
0x1a04   :  { %v3383_v5 = vpop.eup %3382 }
0x1a05   :  { %v1808_v15 = vmul.f32 %v3383_v5, %v1806_v8 }
0x1a65   :  { %v1811_v6 = vpop.permute.xlu0 %1810 }
0x1a66   :  { %v1813_v7 = vmul.f32 %v3383_v5, %v1811_v6 }
0x1a68   :  { %1815 = vrot.lane.b32.xlu0 %v1813_v7, %s3752_s30 }
0x1ada   :  { %v1816_v14 = vpop.permute.xlu0 %1815 }
0x1adb   :  { %v1818_v10 = vadd.f32 %v1816_v14, %v1808_v15 }
0x1add   :  { %3384 = vtanh.f32 %v1818_v10 }
0x1aea   :  { %v3385_v22 = vpop.eup %3384 }
0x1aeb   :  { %1821 = vrot.lane.b32.xlu1 %v3385_v22, %s3751_s20 }
0x1b5d   :  { %v1822_v63 = vpop.permute.xlu1 %1821 }
0x1b5e   :  { %v1824_v16 = vmul.f32 %v3383_v5, %v1822_v63  ;;  %v2889_v5 = vld [vmem:[%s4467_s18] ss:$0 sm:$0xff]  ;;  %v2460_v63 = vsel %vm709_vm6, %v2459_v13, 0.0 }
0x1b60   :  { %1827 = vrot.lane.b32.xlu0 %v1824_v16, %s3752_s30 }
0x1bd2   :  { %v1828_v21 = vpop.permute.xlu0 %1827 }
0x1bd3   :  { %v1830_v23 = vsel %vm1825_vm15, %v1828_v21, %v4274_v53 }
0x1bd4   :  { %3186 = vmatmul.mubr.msk.f32.vlgmr.msra.gmra.mxu1 %vm709_vm6, %v1830_v23 }
0x1bd5   :  { %3200 = vmatpush3.msra.mxu1 %v2007_v4  ;;  %3215 = vmatprep.mubr.msk.f32.mxu1 %vm3750_vm0, %v3749_v1 }
0x1bd6   :  { %3201 = vmatprep.subr.mxu1 %v3749_v1 }
0x1bd7   :  { %3202 = vmatpush3.msra.mxu1 %v2006_v24 }
0x1bd8   :  { %3203 = vmatprep.subr.mxu1 %v3749_v1 }
0x1bd9   :  { %3204 = vmatpush3.msra.mxu1 %v2005_v26 }
0x1bda   :  { %3205 = vmatprep.subr.mxu1 %v3749_v1 }
0x1bdb   :  { %3206 = vmatpush3.msra.mxu1 %v2004_v27 }
0x1bdc   :  { %3207 = vmatprep.subr.mxu1 %v3749_v1 }
0x1bdd   :  { %3208 = vmatpush3.msra.mxu1 %v2003_v40 }
0x1bde   :  { %3209 = vmatprep.subr.mxu1 %v3749_v1 }
0x1bdf   :  { %3210 = vmatpush3.msra.mxu1 %v2002_v54 }
0x1be0   :  { %3211 = vmatprep.subr.mxu1 %v3749_v1 }
0x1be1   :  { %3212 = vmatpush3.msra.mxu1 %v2001_v30 }
0x1be2   :  { %3213 = vmatprep.subr.mxu1 %v3749_v1 }
0x1be3   :  { %3214 = vmatpush3.msra.mxu1 %v2000_v31 }
0x1be4   :  { %3216 = vmatmul.mubr.msk.f32.vlgmr.msra.gmra.mxu1 %vm2015_vm1, %v1999_v32  ;;  %3240 = vmatprep.subr.mxu1 %v3749_v1 }
0x1be5   :  { %3248 = vmatprep.mubr.msk.f32.mxu1 %vm3750_vm0, %v3749_v1  ;;  %3241 = vmatpush3.msra.mxu1 %v2267_v45 }
0x1be6   :  { %3242 = vmatprep.subr.mxu1 %v3749_v1 }
0x1be7   :  { %3243 = vmatpush3.msra.mxu1 %v2266_v46 }
0x1be8   :  { %3244 = vmatprep.subr.mxu1 %v3749_v1 }
0x1be9   :  { %3245 = vmatpush3.msra.mxu1 %v2265_v47 }
0x1bea   :  { %3246 = vmatprep.subr.mxu1 %v3749_v1 }
0x1beb   :  { %3247 = vmatpush3.msra.mxu1 %v2264_v48 }
0x1bec   :  { %3262 = vmatprep.subr.mxu1 %v3749_v1 }
0x1c94   :  { %v1911_v36 = vpop.f32.mrf.mxu1 }
0x1c95   :  { %v4337_v37 = vadd.f32 %v2876_v35, %v1911_v36 }
0x1c96   :  { %v3187_v39 = vpop.f32.mrf.mxu1 }
0x1c97   :  { %3227 = vmatmul.mubr.msk.f32.vlgmr.msra.gmra.mxu0 %vm709_vm6, %v4337_v37  ;;  %v2570_v14 = vmul.f32 %v4337_v37, %v4337_v37 }
0x1c98   :  { %3230 = vmatpush3.msra.mxu0 %v2107_v38  ;;  %3237 = vmatprep.mubr.msk.f32.mxu0 %vm3750_vm0, %v3749_v1 }
0x1c99   :  { %3231 = vmatprep.subr.mxu0 %v3749_v1  ;;  %v2694_v19 = vsel %vm533_vm4, %v2570_v14, 0.0 }
0x1c9a   :  { %3232 = vmatpush3.msra.mxu0 %v2106_v58 }
0x1c9b   :  { %3233 = vmatprep.subr.mxu0 %v3749_v1 }
0x1c9c   :  { %3234 = vmatpush3.msra.mxu0 %v2105_v41 }
0x1c9d   :  { %3235 = vmatprep.subr.mxu0 %v3749_v1 }
0x1c9e   :  { %3236 = vmatpush3.msra.mxu0 %v2104_v42 }
0x1c9f   :  { %3238 = vmatmul.mubr.msk.f32.vlgmr.msra.gmra.mxu0 %vm709_vm6, %v4283_v57  ;;  %3251 = vmatprep.subr.mxu0 %v3749_v1 }
0x1ca0   :  { %3259 = vmatprep.mubr.msk.f32.mxu0 %vm3750_vm0, %v3749_v1  ;;  %3252 = vmatpush3.msra.mxu0 %v2371_v59 }
0x1ca1   :  { %3253 = vmatprep.subr.mxu0 %v3749_v1 }
0x1ca2   :  { %3254 = vmatpush3.msra.mxu0 %v2370_v60 }
0x1ca3   :  { %3255 = vmatprep.subr.mxu0 %v3749_v1 }
0x1ca4   :  { %v4363_v44 = vpop.f32.mrf.mxu1  ;;  %3256 = vmatpush3.msra.mxu0 %v2369_v61 }
0x1ca5   :  { %3257 = vmatprep.subr.mxu0 %v3749_v1 }
0x1ca6   :  { %v3217_v17 = vpop.f32.mrf.mxu1  ;;  %3258 = vmatpush3.msra.mxu0 %v2368_v62 }
0x1ca7   :  { %3267 = vmatprep.subr.mxu0 %v3749_v1 }
0x1d57   :  { %v2181_v49 = vpop.f32.mrf.mxu0 }
0x1d59   :  { %v3228_v51 = vpop.f32.mrf.mxu0 }
0x1d5f   :  { %v2251_v52 = vpop.f32.mrf.mxu0 }
0x1d60   :  { %v2252_v53 = vadd.f32 %v2251_v52, %v2181_v49 }
0x1d61   :  { %v3239_v55 = vpop.f32.mrf.mxu0 }
0x1d62   :  { %v2262_v56 = vadd.f32 %v2884_v50, %v2252_v53  ;;  %v2880_v50 = vld [vmem:[#allocation17] ss:$0 sm:$0xff] }
0x1d63   :  { %v2086_v53 = vadd.f32 %v2880_v50, %v4363_v44 }
0x1d64   :  { %3386 = vtanh.f32 %v2262_v56 }
0x1d65   :  { %v2093_v60 = vsub.f32 0.0, %v2086_v53  ;;  %v2089_v44 = vsub.f32 %v2086_v53, %v4337_v37 }
0x1d71   :  { %v3387_v34 = vpop.eup %3386 }
0x1d72   :  { %3249 = vmatmul.mubr.msk.f32.vlgmr.msra.gmra.mxu1 %vm709_vm6, %v3387_v34 }
0x1d73   :  { %3264 = vmatprep.mubr.msk.f32.mxu1 %vm3750_vm0, %v3749_v1 }
0x1e32   :  { %v2344_v9 = vpop.f32.mrf.mxu1 }
0x1e33   :  { %v2345_v0 = vadd.f32 %v2885_v43, %v2344_v9  ;;  %v2094_v43 = vmul.f32 1.442695, %v2093_v60 }
0x1e34   :  { %v3250_v2 = vpop.f32.mrf.mxu1 }
0x1e35   :  { %3388 = vtanh.f32 %v2345_v0  ;;  %v2090_v2 = vmul.f32 %v2089_v44, %v2089_v44 }
0x1e42   :  { %v4376_v3 = vpop.eup %3388 }
0x1e43   :  { %3260 = vmatmul.mubr.msk.f32.vlgmr.msra.gmra.mxu0 %vm709_vm6, %v4376_v3 }
0x1e44   :  { %3269 = vmatprep.mubr.msk.f32.mxu0 %vm3750_vm0, %v3749_v1 }
0x1f03   :  { %v2448_v6 = vpop.f32.mrf.mxu0 }
0x1f04   :  { %v2449_v7 = vadd.f32 %v2889_v5, %v2448_v6  ;;  %v2091_v6 = vsub.f32 0.0, %v2090_v2 }
0x1f05   :  { %v3261_v8 = vpop.f32.mrf.mxu0 }
0x1f06   :  { %v2452_v15 = vmul.f32 %v2449_v7, %v2449_v7  ;;  %v2092_v8 = vmul.f32 0.5, %v2091_v6 }
0x1f08   :  { %2685 = vrot.lane.b32.xlu0 %v2452_v15, %s3755_s16  ;;  %2561 = vrot.lane.b32.xlu1 %v2452_v15, %s3754_s0  ;;  %v2453_v25 = vsel %vm709_vm6, %v2452_v15, 0.0 }
0x1f0c   :  { %2572 = vrot.lane.b32.xlu1 %v2570_v14, %s3756_s17  ;;  %v2887_v14 = vld [vmem:[#allocation25] ss:$0 sm:$0xff] }
0x1f7a   :  { %v2686_v10 = vpop.permute.xlu0 %2685  ;;  %v2562_v11 = vpop.permute.xlu1 %2561 }
0x1f7b   :  { %v2688_v12 = vsel %vm533_vm4, %v2686_v10, 0.0  ;;  %v2564_v18 = vsel %vm533_vm4, %v2562_v11, 0.0 }
0x1f7c   :  { %2689 = vadd.xlane.f32.xlu1 %v2688_v12  ;;  %2565 = vadd.xlane.f32.xlu0 %v2564_v18  ;;  %v2356_v12 = vmul.f32 %v4376_v3, %v2887_v14 }
0x1f7e   :  { %v2573_v22 = vpop.permute.xlu1 %2572  ;;  %v2357_v18 = vsel %vm709_vm6, %v2356_v12, 0.0 }
0x1f7f   :  { %v2575_v16 = vsel %vm533_vm4, %v2573_v22, 0.0 }
0x1f80   :  { %2461 = vadd.xlane.f32.xlu1 %v2460_v63  ;;  %2576 = vadd.xlane.f32.xlu0 %v2575_v16 }
0x1f84   :  { %2454 = vadd.xlane.f32.xlu0 %v2453_v25 }
0x1f88   :  { %2695 = vadd.xlane.f32.xlu0 %v2694_v19 }
0x2005   :  { %v2566_v20 = vpop.xlane.xlu0 %2565  ;;  %v2690_v21 = vpop.xlane.xlu1 %2689 }
0x2006   :  { %v2567_v4 = vadd.f32 1e-24, %v2566_v20  ;;  %v2691_v23 = vadd.f32 1e-24, %v2690_v21 }
0x2008   :  { %3390 = vrsqrt.f32 %v2567_v4 }
0x2009   :  { %3392 = vrsqrt.f32 %v2691_v23  ;;  %v2577_v24 = vpop.xlane.xlu0 %2576  ;;  %v2462_v26 = vpop.xlane.xlu1 %2461 }
0x200a   :  { %v2578_v27 = vadd.f32 1e-24, %v2577_v24  ;;  %v2463_v40 = vadd.f32 1e-24, %v2462_v26 }
0x200c   :  { %3394 = vrsqrt.f32 %v2578_v27 }
0x200d   :  { %v2455_v28 = vpop.xlane.xlu0 %2454  ;;  %3396 = vrsqrt.f32 %v2463_v40 }
0x200e   :  { %v2456_v54 = vadd.f32 1e-24, %v2455_v28  ;;  %v2888_v28 = vld [vmem:[#allocation2] ss:$0 sm:$0xff] }
0x2010   :  { %3398 = vrsqrt.f32 %v2456_v54 }
0x2011   :  { %v2696_v42 = vpop.xlane.xlu0 %2695 }
0x2012   :  { %v2697_v17 = vadd.f32 1e-24, %v2696_v42 }
0x2014   :  { %3400 = vrsqrt.f32 %v2697_v17 }
0x2015   :  { %v3391_v29 = vpop.eup %3390  ;;  %3402 = vpow2.f32 %v2094_v43 }
0x2016   :  { %v3393_v30 = vpop.eup %3392  ;;  %v2569_v31 = vmul.f32 %v3391_v29, %v2449_v7 }
0x2017   :  { %v2693_v32 = vmul.f32 %v3393_v30, %v2449_v7 }
0x2018   :  { %2596 = vrot.lane.b32.xlu1 %v2569_v31, %s3754_s0 }
0x2019   :  { %v3395_v33 = vpop.eup %3394  ;;  %2701 = vrot.lane.b32.xlu0 %v2693_v32, %s3755_s16 }
0x201a   :  { %v2580_v35 = vmul.f32 %v3395_v33, %v4337_v37  ;;  %v3397_v36 = vpop.eup %3396 }
0x201b   :  { %v2465_v58 = vmul.f32 %v3397_v36, %v4283_v57 }
0x201c   :  { %2594 = vrot.lane.b32.xlu1 %v2580_v35, %s3756_s17 }
0x201d   :  { %v3399_v38 = vpop.eup %3398 }
0x201e   :  { %v2458_v39 = vmul.f32 %v3399_v38, %v2449_v7 }
0x2020   :  { %2582 = vrot.lane.b32.xlu1 %v2569_v31, %s3756_s17  ;;  %3263 = vmatpush3.xpose.msk.msra.mxu1 %vm709_vm6, %v2458_v39  ;;  %v2466_v41 = vmul.f32 %v2465_v58, %v2458_v39 }
0x2021   :  { %3272 = vmatprep.subr.mxu1 %v3749_v1  ;;  %v3401_v45 = vpop.eup %3400 }
0x2022   :  { %v2699_v48 = vmul.f32 %v3401_v45, %v4337_v37  ;;  %v3403_v9 = vpop.eup %3402  ;;  %v2467_v0 = vsel %vm709_vm6, %v2466_v41, 0.0 }
0x2023   :  { %3265 = vmatmul.mubr.msk.f32.vlgmr.msra.gmra.mxu1 %vm709_vm6, %v2465_v58 }
0x2024   :  { %3274 = vmatprep.mubr.msk.f32.mxu1 %vm3750_vm0, %v3749_v1  ;;  %vm2808_vm0 = vcmask 785408  }
0x208a   :  { %v2597_v46 = vpop.permute.xlu1 %2596 }
0x208b   :  { %v2702_v47 = vpop.permute.xlu0 %2701  ;;  %3268 = vmatpush3.xpose.msk.msra.mxu0 %vm533_vm4, %v2597_v46 }
0x208c   :  { %3273 = vmatpush3.xpose.msk.msra.mxu1 %vm533_vm4, %v2702_v47  ;;  %v2704_v19 = vmul.f32 %v2702_v47, %v2699_v48 }
0x208e   :  { %v2595_v49 = vpop.permute.xlu1 %2594  ;;  %v2705_v21 = vsel %vm533_vm4, %v2704_v19, 0.0 }
0x208f   :  { %3275 = vmatmul.mubr.msk.f32.vlgmr.msra.gmra.mxu1 %vm533_vm4, %v2699_v48  ;;  %3270 = vmatmul.mubr.msk.f32.vlgmr.msra.gmra.mxu0 %vm533_vm4, %v2595_v49 }
0x2092   :  { %v2583_v13 = vpop.permute.xlu1 %2582 }
0x2093   :  { %v2585_v22 = vmul.f32 %v2583_v13, %v2580_v35 }
0x20e3   :  { %v2542_v51 = vpop.f32.mrf.mxu1 }
0x20e4   :  { %v2547_v1 = vsel %vm2546_vm2, %v2542_v51, -inf }
0x20e5   :  { %2548 = vmax.xlane.f32.xlu0 %v2547_v1  ;;  %v3266_v52 = vpop.f32.mrf.mxu1 }
0x214f   :  { %v2779_v55 = vpop.f32.mrf.mxu1  ;;  %v2668_v56 = vpop.f32.mrf.mxu0 }
0x2150   :  { %v2783_v34 = vsel %vm2546_vm2, %v2779_v55, -inf  ;;  %v2672_v59 = vsel %vm2546_vm2, %v2668_v56, -inf }
0x2151   :  { %2784 = vmax.xlane.f32.xlu0 %v2783_v34  ;;  %v3276_v61 = vpop.f32.mrf.mxu1  ;;  %2673 = vmax.xlane.f32.xlu1 %v2672_v59  ;;  %v3271_v62 = vpop.f32.mrf.mxu0 }
0x2167   :  { %2097 = vrot.lane.b32.xlu0 %v3403_v9, %s3754_s0 }
0x216e   :  { %v4421_v5 = vpop.xlane.xlu0 %2548 }
0x216f   :  { %v2550_v63 = vsub.f32 %v2542_v51, %v4421_v5 }
0x2171   :  { %v2551_v16 = vmul.f32 1.442695, %v2550_v63 }
0x2173   :  { %3404 = vpow2.f32 %v2551_v16 }
0x2180   :  { %v3405_v25 = vpop.eup %3404 }
0x2181   :  { %v2553_v20 = vsel %vm2546_vm2, %v3405_v25, 0.0 }
0x2186   :  { %2468 = vadd.xlane.f32.xlu0 %v2467_v0 }
0x21da   :  { %v4423_v7 = vpop.xlane.xlu0 %2784  ;;  %v2674_v4 = vpop.xlane.xlu1 %2673 }
0x21db   :  { %v2675_v23 = vsub.f32 %v2668_v56, %v2674_v4  ;;  %v2786_v24 = vsub.f32 %v2779_v55, %v4423_v7 }
0x21dd   :  { %v2676_v26 = vmul.f32 1.442695, %v2675_v23  ;;  %v2787_v27 = vmul.f32 1.442695, %v2786_v24 }
0x21de   :  { %v2098_v15 = vpop.permute.xlu0 %2097 }
0x21df   :  { %v2100_v10 = vmul.f32 %v2098_v15, %v2092_v8  ;;  %3406 = vpow2.f32 %v2676_v26 }
0x21e0   :  { %3408 = vpow2.f32 %v2787_v27 }
0x21e1   :  { %v2101_v11 = vsel %vm709_vm6, %v2100_v10, 0.0 }
0x21e2   :  { %2102 = vadd.xlane.f32.xlu1 %v2101_v11 }
0x21e6   :  { %2358 = vadd.xlane.f32.xlu1 %v2357_v18 }
0x21ec   :  { %v3407_v32 = vpop.eup %3406 }
0x21ed   :  { %v3409_v33 = vpop.eup %3408 }
0x21ee   :  { %v2789_v35 = vsel %vm2546_vm2, %v3409_v33, 0.0 }
0x21f7   :  { %2587 = vrot.lane.b32.xlu1 %v2585_v22, %s3756_s17 }
0x220f   :  { %v2469_v36 = vpop.xlane.xlu0 %2468 }
0x221b   :  { %2554 = vadd.xlane.f32.xlu1 %v2553_v20 }
0x221f   :  { %2706 = vadd.xlane.f32.xlu1 %v2705_v21 }
0x2230   :  { %2799 = vrot.lane.b32.xlu1 %v4376_v3, %s3751_s20  ;;  %v2678_v3 = vsel %vm2546_vm2, %v3407_v32, 0.0 }
0x226b   :  { %v2103_v40 = vpop.xlane.xlu1 %2102 }
0x226f   :  { %v2359_v54 = vpop.xlane.xlu1 %2358 }
0x2270   :  { %v2367_v29 = vadd.f32 %v2888_v28, %v2359_v54 }
0x2272   :  { %2803 = vrot.lane.b32.xlu1 %v2367_v29, %s3754_s0 }
0x2273   :  { %v2588_v30 = vpop.permute.xlu1 %2587 }
0x2274   :  { %v2590_v31 = vsel %vm533_vm4, %v2588_v30, 0.0  ;;  %vm2812_vm4 = vcmask 801792  }
0x2275   :  { %2591 = vadd.xlane.f32.xlu0 %v2590_v31 }
0x2279   :  { %2679 = vadd.xlane.f32.xlu0 %v2678_v3 }
0x227d   :  { %2790 = vadd.xlane.f32.xlu0 %v2789_v35 }
0x2293   :  { %2796 = vrot.lane.b32.xlu0 %v4337_v37, %s3752_s30 }
0x22a4   :  { %v2555_v38 = vpop.xlane.xlu1 %2554 }
0x22a5   :  { %3410 = vlog2.f32 %v2555_v38 }
0x22a8   :  { %v2707_v42 = vpop.xlane.xlu1 %2706 }
0x22ac   :  { %v2800_v47 = vpop.permute.xlu1 %2799 }
0x22b2   :  { %v3411_v45 = vpop.eup %3410 }
0x22b3   :  { %v2557_v48 = vmul.f32 0.6931472, %v3411_v45 }
0x22b5   :  { %v2558_v52 = vadd.f32 %v2557_v48, %v4421_v5 }
0x22b7   :  { %v2559_v60 = vsub.f32 %v2469_v36, %v2558_v52 }
0x22e4   :  { %v2804_v1 = vpop.permute.xlu1 %2803 }
0x22fe   :  { %v2592_v39 = vpop.xlane.xlu0 %2591 }
0x2302   :  { %v2680_v58 = vpop.xlane.xlu0 %2679 }
0x2303   :  { %3412 = vlog2.f32 %v2680_v58 }
0x2306   :  { %v2791_v41 = vpop.xlane.xlu0 %2790 }
0x2307   :  { %3414 = vlog2.f32 %v2791_v41 }
0x230a   :  { %v2797_v17 = vpop.permute.xlu0 %2796 }
0x230b   :  { %v2806_v46 = vsel %vm709_vm6, %v4283_v57, %v2797_v17  ;;  %vm2816_vm6 = vcmask 818176  }
0x230c   :  { %v2807_v37 = vsel %vm2015_vm1, %v2806_v46, %v2800_v47 }
0x230d   :  { %v2809_v53 = vsel %vm2808_vm0, %v2807_v37, %v2804_v1 }
0x230e   :  { %v2811_v59 = vsel %vm2810_vm3, %v2809_v53, %v2103_v40 }
0x230f   :  { %v2813_v62 = vsel %vm2812_vm4, %v2811_v59, %v2559_v60 }
0x2310   :  { %v3413_v49 = vpop.eup %3412 }
0x2311   :  { %v2682_v51 = vmul.f32 0.6931472, %v3413_v49 }
0x2313   :  { %v2683_v50 = vadd.f32 %v2682_v51, %v2674_v4 }
0x2314   :  { %v3415_v55 = vpop.eup %3414 }
0x2315   :  { %v2793_v56 = vmul.f32 0.6931472, %v3415_v55  ;;  %v2684_v34 = vsub.f32 %v2592_v39, %v2683_v50 }
0x2317   :  { %v2794_v57 = vadd.f32 %v2793_v56, %v4423_v7  ;;  %v2815_v43 = vsel %vm2814_vm5, %v2813_v62, %v2684_v34 }
0x2319   :  { %v2795_v61 = vsub.f32 %v2707_v42, %v2794_v57 }
0x231b   :  { %v2817_v9 = vsel %vm2816_vm6, %v2815_v43, %v2795_v61 }
0x231c   :  { %v2819_v0 = vsel %vm2818_vm7, %v2817_v9, 0.0 }
0x231d   :  { %2820 = vst [vmem:[%s4474_s25] sm:$0xff] %v2819_v0 }
0x231e   :  { %2825 = vsyncpa [#allocation4], 1 }
0x231f   :  { %2826 = vsyncpa [#allocation6], 1 }
0x2320   :  { %2827 = vsyncpa [#allocation9], 1 }
0x2321   :  { %2828 = vsyncpa [#allocation12], 1 }
0x2322   :  { %2829 = vsyncpa [#allocation15], 1 }
0x2323   :  { %2830 = vsyncpa [#allocation18], 1 }
0x2324   :  { %2831 = vsyncpa [#allocation21], 1 }
0x2325   :  { %2832 = vsyncpa [#allocation24], 1 }

</bundles_post_ra>
